<compile_context>
chip_gen: v7x
topology: tpu7x:2x2x1
jax: 0.10.0
libtpu: 0.0.40
codegen_flags: <defaults>
</compile_context>

<pallas_src>
import functools

import jax
import jax.numpy as jnp
from jax.experimental import pallas as pl
from jax.experimental.pallas import tpu as pltpu


# ----------------------------- activations ---------------------------------
def _relu6(x):
    return jnp.minimum(jnp.maximum(x, 0.0), 6.0)


def _hswish(x):
    return x * _relu6(x + 3.0) * (1.0 / 6.0)


def _hsigmoid(x):
    return _relu6(x + 3.0) * (1.0 / 6.0)


def _bf16_round(a):
    return a.astype(jnp.bfloat16).astype(jnp.float32)


# ------------------------------ fused kernel --------------------------------
def _fused_block_kernel(x_ref, wexp_ref, bexp_ref, wdw_ref, bdw_ref,
                        pool_ref, wse1_ref, bse1_ref, wse2_ref, bse2_ref,
                        bcast_ref, wpw_ref, bpw_ref, o_ref,
                        *, B, H, W, Cmid, use_residual):
    WC = W * Cmid
    bf16 = jnp.bfloat16

    # (B, H, W*Cin) bf16 -> rows flattened for the 1x1 matmuls (row independent).
    x2 = x_ref[...].reshape(B * H, x_ref.shape[-1])

    # expand 1x1 + folded BN + h-swish; the reflect COLUMN halo is baked into the
    # weight, so the result already has W+2 column groups.
    e = jnp.dot(x2, wexp_ref[...], preferred_element_type=jnp.float32) + bexp_ref[...]
    e = _hswish(e)                                            # (B*H, (W+2)*Cmid) f32
    e3 = e.reshape(B, H, (W + 2) * Cmid)

    # reflect ROW halo, built in registers (no HBM pad).
    ep = jnp.concatenate([e3[:, 1:2, :], e3, e3[:, H - 2:H - 1, :]], axis=1)

    # depthwise 3x3 (stride 1): 9 VPU multiply-adds on lane-shifted slabs.
    acc = jnp.zeros((B, H, WC), jnp.float32)
    for dy in range(3):
        rows = ep[:, dy:dy + H, :]                            # (B, H, (W+2)*Cmid)
        for dx in range(3):
            k = 3 * dy + dx
            tap = wdw_ref[k:k + 1, :]                         # (1, W*Cmid) f32
            acc = acc + rows[:, :, dx * Cmid:dx * Cmid + WC] * tap
    d = _hswish(acc + bdw_ref[...])                           # (B, H, W*Cmid) f32

    # squeeze-and-excitation, per image (bf16 MXU operands, f32 accumulation).
    row_sum = jnp.sum(d, axis=1).astype(bf16)                 # (B, W*Cmid)
    pooled = jnp.dot(row_sum, pool_ref[...],
                     preferred_element_type=jnp.float32) * (1.0 / (H * W))   # (B, Cmid)
    hid = jnp.maximum(
        jnp.dot(pooled.astype(bf16), wse1_ref[...],
                preferred_element_type=jnp.float32) + bse1_ref[...], 0.0)
    se = _hsigmoid(
        jnp.dot(hid.astype(bf16), wse2_ref[...],
                preferred_element_type=jnp.float32) + bse2_ref[...])          # (B, Cmid)
    se_row = jnp.dot(se.astype(bf16), bcast_ref[...],
                     preferred_element_type=jnp.float32)                      # (B, W*Cmid)
    d = d * se_row[:, None, :]

    # pointwise 1x1 + folded BN (+ residual, compile-time variant).
    d2 = d.reshape(B * H, WC).astype(bf16)
    y = jnp.dot(d2, wpw_ref[...], preferred_element_type=jnp.float32) + bpw_ref[...]
    if use_residual:
        y = y + x2.astype(jnp.float32)
    o_ref[...] = y.reshape(B, H, -1).astype(o_ref.dtype)


# ------------------------------- wrapper -------------------------------------
def mobilenetv3_block(x_nchw, kp, *, stride=1):
    assert stride == 1, "TODO(synk): stride=2 path not implemented"
    N, Cin, H, W = x_nchw.shape
    Cmid, Cout = kp["cmid"], kp["cout"]
    assert H >= 2 and W >= 2, "reflect padding needs H, W >= 2"
    assert H % 8 == 0, "H must be a multiple of 8 for clean sublane tiling"
    assert (W * Cin) % 128 == 0 and (W * Cmid) % 128 == 0 and (W * Cout) % 128 == 0, \
        "W*C must be a multiple of 128 for lane-dense blocks (else masked partial stores)"
    use_residual = (stride == 1 and Cin == Cout)

    # Images per grid step so the matmul M dimension (~B*H rows) feeds the MXU;
    # B must divide N so the blocks tile exactly.
    B = max(1, min(N, 256 // H))
    while N % B:
        B -= 1

    # NHWC with the (w, c) pair flattened onto lanes; bf16 halves HBM traffic.
    x_hw = (jnp.transpose(x_nchw, (0, 2, 3, 1))
            .reshape(N, H, W * Cin).astype(jnp.bfloat16))

    full = lambda a: pl.BlockSpec(a.shape, lambda n: (0,) * a.ndim)
    weights = [kp["w_exp_pad"], kp["b_exp_pad"], kp["w_dw_lane"], kp["b_dw_t"],
               kp["pool_mat"], kp["w_se1"], kp["b_se1"], kp["w_se2"], kp["b_se2"],
               kp["bcast_mat"], kp["w_pw_blk"], kp["b_pw_t"]]

    out = pl.pallas_call(
        functools.partial(_fused_block_kernel, B=B, H=H, W=W, Cmid=Cmid,
                          use_residual=use_residual),
        out_shape=jax.ShapeDtypeStruct((N, H, W * Cout), jnp.bfloat16),
        grid=(N // B,),
        in_specs=[pl.BlockSpec((B, H, W * Cin), lambda n: (n, 0, 0))]
                 + [full(w) for w in weights],
        out_specs=pl.BlockSpec((B, H, W * Cout), lambda n: (n, 0, 0)),
        compiler_params=pltpu.CompilerParams(
            dimension_semantics=("parallel",),
            vmem_limit_bytes=32 * 1024 * 1024),
    )(x_hw, *weights)

    y = jnp.transpose(out.reshape(N, H, W, Cout), (0, 3, 1, 2))
    return y.astype(jnp.float32)                               # back to NCHW


# --------------------------- parameter creation / packing --------------------
def make_params(key, in_channels, out_channels, expansion_factor=2):
    """Raw (PyTorch-like) parameters: conv weights/biases + eval-mode BN stats."""
    cmid = int(in_channels * expansion_factor)
    cse = max(1, cmid // 4)
    ks = iter(jax.random.split(key, 24))
    n = lambda shape, s=0.3: (s * jax.random.normal(next(ks), shape)).astype(jnp.float32)

    def bn(c):
        return dict(
            gamma=jax.random.uniform(next(ks), (c,), minval=0.8, maxval=1.2).astype(jnp.float32),
            beta=(0.05 * jax.random.normal(next(ks), (c,))).astype(jnp.float32),
            mean=(0.05 * jax.random.normal(next(ks), (c,))).astype(jnp.float32),
            var=jax.random.uniform(next(ks), (c,), minval=0.8, maxval=1.2).astype(jnp.float32))

    return dict(
        w_exp=n((in_channels, cmid)), b_exp=n((cmid,), 0.1), bn_exp=bn(cmid),
        w_dw=n((3, 3, cmid)), b_dw=n((cmid,), 0.1), bn_dw=bn(cmid),
        w_se1=n((cmid, cse)), b_se1=n((cse,), 0.1),
        w_se2=n((cse, cmid)), b_se2=n((cmid,), 0.1),
        w_pw=n((cmid, out_channels)), b_pw=n((out_channels,), 0.1), bn_pw=bn(out_channels),
        cmid=cmid, cse=cse)


def _fold_bn(w, b, bn, eps=1e-5):
    s = bn["gamma"] * jax.lax.rsqrt(bn["var"] + eps)
    t = bn["beta"] - bn["mean"] * s
    return w * s, b * s + t     # scale over the output-channel (last) axis


def pack_params(p, H, W):
    """Fold eval-mode BN into the conv weights, round to bf16, and pack into the
    interleaved-lane layouts used by the fused kernel."""
    Cin, Cmid = p["w_exp"].shape
    Cout = p["w_pw"].shape[1]

    w_exp_f, b_exp_f = _fold_bn(p["w_exp"], p["b_exp"], p["bn_exp"])
    w_dw_f, b_dw_f = _fold_bn(p["w_dw"], p["b_dw"], p["bn_dw"])
    w_pw_f, b_pw_f = _fold_bn(p["w_pw"], p["b_pw"], p["bn_pw"])
    w_exp_q, w_dw_q, w_pw_q = map(_bf16_round, (w_exp_f, w_dw_f, w_pw_f))

    # expand 1x1 as a block matmul over the interleaved (w, cin) lanes, with the
    # reflect column-halo baked in (output columns are padded cols 0..W+1).
    src = jnp.array([1] + list(range(W)) + [W - 2], dtype=jnp.int32)   # reflect map
    sel = jnp.zeros((W, W + 2), jnp.float32).at[src, jnp.arange(W + 2)].set(1.0)
    w_exp_pad = jnp.einsum("wq,ic->wiqc", sel, w_exp_q).reshape(W * Cin, (W + 2) * Cmid)
    b_exp_pad = jnp.tile(b_exp_f, W + 2).reshape(1, (W + 2) * Cmid)

    # depthwise 3x3: 9 per-lane tap weight rows, each the per-channel weight tiled
    # across the W column groups (VPU operands, kept f32).
    w_dw_lane = jnp.stack([jnp.tile(w_dw_q[dy, dx], W)
                           for dy in range(3) for dx in range(3)], axis=0)   # (9, W*Cmid)
    b_dw_t = jnp.tile(b_dw_f, W).reshape(1, W * Cmid)

    # SE pool/broadcast selection matrices between (w, c) lanes and channels (0/1,
    # exact in bf16); SE FC weights in bf16 for the MXU.
    pool_mat = jnp.tile(jnp.eye(Cmid, dtype=jnp.float32), (W, 1))      # (W*Cmid, Cmid)
    bcast_mat = pool_mat.T                                             # (Cmid, W*Cmid)

    # pointwise 1x1 as a block-diagonal matmul (fine at toy W; tile W in production).
    w_pw_blk = jnp.kron(jnp.eye(W, dtype=jnp.float32), w_pw_q)         # (W*Cmid, W*Cout)
    b_pw_t = jnp.tile(b_pw_f, W).reshape(1, W * Cout)

    bf16 = jnp.bfloat16
    return dict(
        w_exp_pad=w_exp_pad.astype(bf16), b_exp_pad=b_exp_pad,
        w_dw_lane=w_dw_lane, b_dw_t=b_dw_t,
        pool_mat=pool_mat.astype(bf16), bcast_mat=bcast_mat.astype(bf16),
        w_se1=p["w_se1"].astype(bf16), b_se1=p["b_se1"].reshape(1, -1),
        w_se2=p["w_se2"].astype(bf16), b_se2=p["b_se2"].reshape(1, -1),
        w_pw_blk=w_pw_blk.astype(bf16), b_pw_t=b_pw_t,
        cmid=Cmid, cout=Cout,
        # standard-layout (folded + bf16-rounded) copies for the reference
        w_exp_q=w_exp_q, b_exp_f=b_exp_f, w_dw_q=w_dw_q, b_dw_f=b_dw_f,
        w_pw_q=w_pw_q, b_pw_f=b_pw_f)


# ------------------------------ pure-JAX reference ---------------------------
def reference(x_nchw, p, kp):
    """Module forward (eval-mode BN folded) in f32, mirroring the kernel's bf16
    rounding points (input, SE matmul operands, pre-pointwise activation)."""
    q = _bf16_round
    x = q(jnp.transpose(x_nchw, (0, 2, 3, 1)).astype(jnp.float32))     # NHWC
    N, H, W, Cin = x.shape
    e = jnp.einsum("nhwc,cd->nhwd", x, kp["w_exp_q"]) + kp["b_exp_f"]
    e = _hswish(e)
    ep = jnp.pad(e, ((0, 0), (1, 1), (1, 1), (0, 0)), mode="reflect")
    d = sum(ep[:, dy:dy + H, dx:dx + W, :] * kp["w_dw_q"][dy, dx]
            for dy in range(3) for dx in range(3))
    d = _hswish(d + kp["b_dw_f"])
    # SE path with the same bf16 rounding points as the kernel.
    row_sum = q(d.sum(axis=1))                          # (N, W, Cmid)
    pooled = row_sum.sum(axis=1) * (1.0 / (H * W))      # (N, Cmid)
    hid = jnp.maximum(q(pooled) @ q(p["w_se1"]) + p["b_se1"], 0.0)
    se = _hsigmoid(q(hid) @ q(p["w_se2"]) + p["b_se2"])
    d = q(d * q(se)[:, None, None, :])
    y = jnp.einsum("nhwc,cd->nhwd", d, kp["w_pw_q"]) + kp["b_pw_f"]
    y = y + x                           # residual (stride=1, Cin == Cout)
    return jnp.transpose(y, (0, 3, 1, 2))


# ----------------------------------- main -------------------------------------
if __name__ == "__main__":
    key = jax.random.PRNGKey(0)
    kx, kparams = jax.random.split(key)

    N, C, H, W = 2, 8, 16, 16          # in_channels == out_channels, stride=1 -> residual
    x = jax.random.normal(kx, (N, C, H, W), dtype=jnp.float32)
    raw = make_params(kparams, in_channels=C, out_channels=C, expansion_factor=2)
    packed = pack_params(raw, H, W)

    out = mobilenetv3_block(x, packed, stride=1)
    out = jax.block_until_ready(out)

    ref = reference(x, raw, packed)
    assert out.shape == (N, C, H, W)
    max_err = float(jnp.max(jnp.abs(out - ref)))
    assert jnp.allclose(out, ref, rtol=2e-2, atol=2e-2), \
        f"mismatch vs pure-JAX reference (max abs err {max_err})"

    print("KERNEL_OK")
</pallas_src>

<mosaic_0001>
module attributes {stable_mosaic.version = 11 : i64} {
  func.func @_fused_block_kernel(%arg0: i32, %arg1: memref<2x16x128xbf16, #tpu.memory_space<vmem>>, %arg2: memref<128x288xbf16, #tpu.memory_space<vmem>>, %arg3: memref<1x288xf32, #tpu.memory_space<vmem>>, %arg4: memref<9x256xf32, #tpu.memory_space<vmem>>, %arg5: memref<1x256xf32, #tpu.memory_space<vmem>>, %arg6: memref<256x16xbf16, #tpu.memory_space<vmem>>, %arg7: memref<16x4xbf16, #tpu.memory_space<vmem>>, %arg8: memref<1x4xf32, #tpu.memory_space<vmem>>, %arg9: memref<4x16xbf16, #tpu.memory_space<vmem>>, %arg10: memref<1x16xf32, #tpu.memory_space<vmem>>, %arg11: memref<16x256xbf16, #tpu.memory_space<vmem>>, %arg12: memref<256x128xbf16, #tpu.memory_space<vmem>>, %arg13: memref<1x128xf32, #tpu.memory_space<vmem>>, %arg14: memref<2x16x128xbf16, #tpu.memory_space<vmem>>) attributes {dimension_semantics = [#tpu.dimension_semantics<parallel>], iteration_bounds = array<i64: 1>, scalar_prefetch = 0 : i64, scratch_operands = 0 : i64, tpu.core_type = #tpu.core_type<tc>, window_params = [{transform_indices = @transform_0, window_bounds = array<i64: 2, 16, 128>}, {pipeline_mode = #tpu.pipeline_mode<synchronous>, transform_indices = @transform_1, window_bounds = array<i64: 128, 288>}, {pipeline_mode = #tpu.pipeline_mode<synchronous>, transform_indices = @transform_2, window_bounds = array<i64: 1, 288>}, {pipeline_mode = #tpu.pipeline_mode<synchronous>, transform_indices = @transform_3, window_bounds = array<i64: 9, 256>}, {pipeline_mode = #tpu.pipeline_mode<synchronous>, transform_indices = @transform_4, window_bounds = array<i64: 1, 256>}, {pipeline_mode = #tpu.pipeline_mode<synchronous>, transform_indices = @transform_5, window_bounds = array<i64: 256, 16>}, {pipeline_mode = #tpu.pipeline_mode<synchronous>, transform_indices = @transform_6, window_bounds = array<i64: 16, 4>}, {pipeline_mode = #tpu.pipeline_mode<synchronous>, transform_indices = @transform_7, window_bounds = array<i64: 1, 4>}, {pipeline_mode = #tpu.pipeline_mode<synchronous>, transform_indices = @transform_8, window_bounds = array<i64: 4, 16>}, {pipeline_mode = #tpu.pipeline_mode<synchronous>, transform_indices = @transform_9, window_bounds = array<i64: 1, 16>}, {pipeline_mode = #tpu.pipeline_mode<synchronous>, transform_indices = @transform_10, window_bounds = array<i64: 16, 256>}, {pipeline_mode = #tpu.pipeline_mode<synchronous>, transform_indices = @transform_11, window_bounds = array<i64: 256, 128>}, {pipeline_mode = #tpu.pipeline_mode<synchronous>, transform_indices = @transform_12, window_bounds = array<i64: 1, 128>}, {transform_indices = @transform_13, window_bounds = array<i64: 2, 16, 128>}]} {
    %c0 = arith.constant 0 : index
    %c0_0 = arith.constant 0 : index
    %c0_1 = arith.constant 0 : index
    %0 = vector.load %arg1[%c0, %c0_0, %c0_1] : memref<2x16x128xbf16, #tpu.memory_space<vmem>>, vector<2x16x128xbf16>
    %1 = vector.shape_cast %0 : vector<2x16x128xbf16> to vector<32x128xbf16>
    %c0_2 = arith.constant 0 : index
    %c0_3 = arith.constant 0 : index
    %2 = vector.load %arg2[%c0_2, %c0_3] : memref<128x288xbf16, #tpu.memory_space<vmem>>, vector<128x288xbf16>
    %cst = arith.constant dense<0.000000e+00> : vector<32x288xf32>
    %3 = tpu.matmul %1, %2, %cst {dimension_numbers = #tpu.dot_dimension_numbers<[1], [0], [0], [1], [0, 0, 1, 1], [], []>} : vector<32x128xbf16>, vector<128x288xbf16>, vector<32x288xf32> -> vector<32x288xf32>
    %c0_4 = arith.constant 0 : index
    %c0_5 = arith.constant 0 : index
    %4 = vector.load %arg3[%c0_4, %c0_5] : memref<1x288xf32, #tpu.memory_space<vmem>>, vector<1x288xf32>
    %5 = vector.broadcast %4 : vector<1x288xf32> to vector<32x288xf32>
    %6 = arith.addf %3, %5 : vector<32x288xf32>
    %cst_6 = arith.constant 3.000000e+00 : f32
    %7 = vector.broadcast %cst_6 : f32 to vector<32x288xf32>
    %8 = arith.addf %6, %7 : vector<32x288xf32>
    %cst_7 = arith.constant 0.000000e+00 : f32
    %9 = vector.broadcast %cst_7 : f32 to vector<32x288xf32>
    %10 = arith.maximumf %8, %9 : vector<32x288xf32>
    %cst_8 = arith.constant 6.000000e+00 : f32
    %11 = vector.broadcast %cst_8 : f32 to vector<32x288xf32>
    %12 = arith.minimumf %10, %11 : vector<32x288xf32>
    %13 = arith.mulf %6, %12 : vector<32x288xf32>
    %cst_9 = arith.constant 0.166666672 : f32
    %14 = vector.broadcast %cst_9 : f32 to vector<32x288xf32>
    %15 = arith.mulf %13, %14 : vector<32x288xf32>
    %16 = vector.shape_cast %15 : vector<32x288xf32> to vector<2x16x288xf32>
    %17 = vector.extract_strided_slice %16 {offsets = [0, 1, 0], sizes = [2, 1, 288], strides = [1, 1, 1]} : vector<2x16x288xf32> to vector<2x1x288xf32>
    %18 = vector.extract_strided_slice %16 {offsets = [0, 14, 0], sizes = [2, 1, 288], strides = [1, 1, 1]} : vector<2x16x288xf32> to vector<2x1x288xf32>
    %19 = tpu.concatenate %17, %16, %18 in 1 : vector<2x1x288xf32>, vector<2x16x288xf32>, vector<2x1x288xf32> -> vector<2x18x288xf32>
    %cst_10 = arith.constant 0.000000e+00 : f32
    %20 = vector.broadcast %cst_10 : f32 to vector<2x16x256xf32>
    %21 = vector.extract_strided_slice %19 {offsets = [0, 0, 0], sizes = [2, 16, 288], strides = [1, 1, 1]} : vector<2x18x288xf32> to vector<2x16x288xf32>
    %c0_11 = arith.constant 0 : index
    %c0_12 = arith.constant 0 : index
    %22 = vector.load %arg4[%c0_11, %c0_12] : memref<9x256xf32, #tpu.memory_space<vmem>>, vector<1x256xf32>
    %23 = vector.extract_strided_slice %21 {offsets = [0, 0, 0], sizes = [2, 16, 256], strides = [1, 1, 1]} : vector<2x16x288xf32> to vector<2x16x256xf32>
    %24 = vector.shape_cast %22 : vector<1x256xf32> to vector<1x1x256xf32>
    %25 = vector.broadcast %24 : vector<1x1x256xf32> to vector<2x16x256xf32>
    %26 = arith.mulf %23, %25 : vector<2x16x256xf32>
    %27 = arith.addf %20, %26 : vector<2x16x256xf32>
    %c1 = arith.constant 1 : index
    %c0_13 = arith.constant 0 : index
    %28 = vector.load %arg4[%c1, %c0_13] : memref<9x256xf32, #tpu.memory_space<vmem>>, vector<1x256xf32>
    %29 = vector.extract_strided_slice %21 {offsets = [0, 0, 16], sizes = [2, 16, 256], strides = [1, 1, 1]} : vector<2x16x288xf32> to vector<2x16x256xf32>
    %30 = vector.shape_cast %28 : vector<1x256xf32> to vector<1x1x256xf32>
    %31 = vector.broadcast %30 : vector<1x1x256xf32> to vector<2x16x256xf32>
    %32 = arith.mulf %29, %31 : vector<2x16x256xf32>
    %33 = arith.addf %27, %32 : vector<2x16x256xf32>
    %c2 = arith.constant 2 : index
    %c0_14 = arith.constant 0 : index
    %34 = vector.load %arg4[%c2, %c0_14] : memref<9x256xf32, #tpu.memory_space<vmem>>, vector<1x256xf32>
    %35 = vector.extract_strided_slice %21 {offsets = [0, 0, 32], sizes = [2, 16, 256], strides = [1, 1, 1]} : vector<2x16x288xf32> to vector<2x16x256xf32>
    %36 = vector.shape_cast %34 : vector<1x256xf32> to vector<1x1x256xf32>
    %37 = vector.broadcast %36 : vector<1x1x256xf32> to vector<2x16x256xf32>
    %38 = arith.mulf %35, %37 : vector<2x16x256xf32>
    %39 = arith.addf %33, %38 : vector<2x16x256xf32>
    %40 = vector.extract_strided_slice %19 {offsets = [0, 1, 0], sizes = [2, 16, 288], strides = [1, 1, 1]} : vector<2x18x288xf32> to vector<2x16x288xf32>
    %c3 = arith.constant 3 : index
    %c0_15 = arith.constant 0 : index
    %41 = vector.load %arg4[%c3, %c0_15] : memref<9x256xf32, #tpu.memory_space<vmem>>, vector<1x256xf32>
    %42 = vector.extract_strided_slice %40 {offsets = [0, 0, 0], sizes = [2, 16, 256], strides = [1, 1, 1]} : vector<2x16x288xf32> to vector<2x16x256xf32>
    %43 = vector.shape_cast %41 : vector<1x256xf32> to vector<1x1x256xf32>
    %44 = vector.broadcast %43 : vector<1x1x256xf32> to vector<2x16x256xf32>
    %45 = arith.mulf %42, %44 : vector<2x16x256xf32>
    %46 = arith.addf %39, %45 : vector<2x16x256xf32>
    %c4 = arith.constant 4 : index
    %c0_16 = arith.constant 0 : index
    %47 = vector.load %arg4[%c4, %c0_16] : memref<9x256xf32, #tpu.memory_space<vmem>>, vector<1x256xf32>
    %48 = vector.extract_strided_slice %40 {offsets = [0, 0, 16], sizes = [2, 16, 256], strides = [1, 1, 1]} : vector<2x16x288xf32> to vector<2x16x256xf32>
    %49 = vector.shape_cast %47 : vector<1x256xf32> to vector<1x1x256xf32>
    %50 = vector.broadcast %49 : vector<1x1x256xf32> to vector<2x16x256xf32>
    %51 = arith.mulf %48, %50 : vector<2x16x256xf32>
    %52 = arith.addf %46, %51 : vector<2x16x256xf32>
    %c5 = arith.constant 5 : index
    %c0_17 = arith.constant 0 : index
    %53 = vector.load %arg4[%c5, %c0_17] : memref<9x256xf32, #tpu.memory_space<vmem>>, vector<1x256xf32>
    %54 = vector.extract_strided_slice %40 {offsets = [0, 0, 32], sizes = [2, 16, 256], strides = [1, 1, 1]} : vector<2x16x288xf32> to vector<2x16x256xf32>
    %55 = vector.shape_cast %53 : vector<1x256xf32> to vector<1x1x256xf32>
    %56 = vector.broadcast %55 : vector<1x1x256xf32> to vector<2x16x256xf32>
    %57 = arith.mulf %54, %56 : vector<2x16x256xf32>
    %58 = arith.addf %52, %57 : vector<2x16x256xf32>
    %59 = vector.extract_strided_slice %19 {offsets = [0, 2, 0], sizes = [2, 16, 288], strides = [1, 1, 1]} : vector<2x18x288xf32> to vector<2x16x288xf32>
    %c6 = arith.constant 6 : index
    %c0_18 = arith.constant 0 : index
    %60 = vector.load %arg4[%c6, %c0_18] : memref<9x256xf32, #tpu.memory_space<vmem>>, vector<1x256xf32>
    %61 = vector.extract_strided_slice %59 {offsets = [0, 0, 0], sizes = [2, 16, 256], strides = [1, 1, 1]} : vector<2x16x288xf32> to vector<2x16x256xf32>
    %62 = vector.shape_cast %60 : vector<1x256xf32> to vector<1x1x256xf32>
    %63 = vector.broadcast %62 : vector<1x1x256xf32> to vector<2x16x256xf32>
    %64 = arith.mulf %61, %63 : vector<2x16x256xf32>
    %65 = arith.addf %58, %64 : vector<2x16x256xf32>
    %c7 = arith.constant 7 : index
    %c0_19 = arith.constant 0 : index
    %66 = vector.load %arg4[%c7, %c0_19] : memref<9x256xf32, #tpu.memory_space<vmem>>, vector<1x256xf32>
    %67 = vector.extract_strided_slice %59 {offsets = [0, 0, 16], sizes = [2, 16, 256], strides = [1, 1, 1]} : vector<2x16x288xf32> to vector<2x16x256xf32>
    %68 = vector.shape_cast %66 : vector<1x256xf32> to vector<1x1x256xf32>
    %69 = vector.broadcast %68 : vector<1x1x256xf32> to vector<2x16x256xf32>
    %70 = arith.mulf %67, %69 : vector<2x16x256xf32>
    %71 = arith.addf %65, %70 : vector<2x16x256xf32>
    %c8 = arith.constant 8 : index
    %c0_20 = arith.constant 0 : index
    %72 = vector.load %arg4[%c8, %c0_20] : memref<9x256xf32, #tpu.memory_space<vmem>>, vector<1x256xf32>
    %73 = vector.extract_strided_slice %59 {offsets = [0, 0, 32], sizes = [2, 16, 256], strides = [1, 1, 1]} : vector<2x16x288xf32> to vector<2x16x256xf32>
    %74 = vector.shape_cast %72 : vector<1x256xf32> to vector<1x1x256xf32>
    %75 = vector.broadcast %74 : vector<1x1x256xf32> to vector<2x16x256xf32>
    %76 = arith.mulf %73, %75 : vector<2x16x256xf32>
    %77 = arith.addf %71, %76 : vector<2x16x256xf32>
    %c0_21 = arith.constant 0 : index
    %c0_22 = arith.constant 0 : index
    %78 = vector.load %arg5[%c0_21, %c0_22] : memref<1x256xf32, #tpu.memory_space<vmem>>, vector<1x256xf32>
    %79 = vector.shape_cast %78 : vector<1x256xf32> to vector<1x1x256xf32>
    %80 = vector.broadcast %79 : vector<1x1x256xf32> to vector<2x16x256xf32>
    %81 = arith.addf %77, %80 : vector<2x16x256xf32>
    %cst_23 = arith.constant 3.000000e+00 : f32
    %82 = vector.broadcast %cst_23 : f32 to vector<2x16x256xf32>
    %83 = arith.addf %81, %82 : vector<2x16x256xf32>
    %cst_24 = arith.constant 0.000000e+00 : f32
    %84 = vector.broadcast %cst_24 : f32 to vector<2x16x256xf32>
    %85 = arith.maximumf %83, %84 : vector<2x16x256xf32>
    %cst_25 = arith.constant 6.000000e+00 : f32
    %86 = vector.broadcast %cst_25 : f32 to vector<2x16x256xf32>
    %87 = arith.minimumf %85, %86 : vector<2x16x256xf32>
    %88 = arith.mulf %81, %87 : vector<2x16x256xf32>
    %cst_26 = arith.constant 0.166666672 : f32
    %89 = vector.broadcast %cst_26 : f32 to vector<2x16x256xf32>
    %90 = arith.mulf %88, %89 : vector<2x16x256xf32>
    %cst_27 = arith.constant dense<0.000000e+00> : vector<2x256xf32>
    %91 = vector.multi_reduction <add>, %90, %cst_27 [1] : vector<2x16x256xf32> to vector<2x256xf32>
    %92 = arith.truncf %91 : vector<2x256xf32> to vector<2x256xbf16>
    %c0_28 = arith.constant 0 : index
    %c0_29 = arith.constant 0 : index
    %93 = vector.load %arg6[%c0_28, %c0_29] : memref<256x16xbf16, #tpu.memory_space<vmem>>, vector<256x16xbf16>
    %cst_30 = arith.constant dense<0.000000e+00> : vector<2x16xf32>
    %94 = tpu.matmul %92, %93, %cst_30 {dimension_numbers = #tpu.dot_dimension_numbers<[1], [0], [0], [1], [0, 0, 1, 1], [], []>} : vector<2x256xbf16>, vector<256x16xbf16>, vector<2x16xf32> -> vector<2x16xf32>
    %cst_31 = arith.constant 3.906250e-03 : f32
    %95 = vector.broadcast %cst_31 : f32 to vector<2x16xf32>
    %96 = arith.mulf %94, %95 : vector<2x16xf32>
    %97 = arith.truncf %96 : vector<2x16xf32> to vector<2x16xbf16>
    %c0_32 = arith.constant 0 : index
    %c0_33 = arith.constant 0 : index
    %98 = vector.load %arg7[%c0_32, %c0_33] : memref<16x4xbf16, #tpu.memory_space<vmem>>, vector<16x4xbf16>
    %cst_34 = arith.constant dense<0.000000e+00> : vector<2x4xf32>
    %99 = tpu.matmul %97, %98, %cst_34 {dimension_numbers = #tpu.dot_dimension_numbers<[1], [0], [0], [1], [0, 0, 1, 1], [], []>} : vector<2x16xbf16>, vector<16x4xbf16>, vector<2x4xf32> -> vector<2x4xf32>
    %c0_35 = arith.constant 0 : index
    %c0_36 = arith.constant 0 : index
    %100 = vector.load %arg8[%c0_35, %c0_36] : memref<1x4xf32, #tpu.memory_space<vmem>>, vector<1x4xf32>
    %101 = vector.broadcast %100 : vector<1x4xf32> to vector<2x4xf32>
    %102 = arith.addf %99, %101 : vector<2x4xf32>
    %cst_37 = arith.constant 0.000000e+00 : f32
    %103 = vector.broadcast %cst_37 : f32 to vector<2x4xf32>
    %104 = arith.maximumf %102, %103 : vector<2x4xf32>
    %105 = arith.truncf %104 : vector<2x4xf32> to vector<2x4xbf16>
    %c0_38 = arith.constant 0 : index
    %c0_39 = arith.constant 0 : index
    %106 = vector.load %arg9[%c0_38, %c0_39] : memref<4x16xbf16, #tpu.memory_space<vmem>>, vector<4x16xbf16>
    %cst_40 = arith.constant dense<0.000000e+00> : vector<2x16xf32>
    %107 = tpu.matmul %105, %106, %cst_40 {dimension_numbers = #tpu.dot_dimension_numbers<[1], [0], [0], [1], [0, 0, 1, 1], [], []>} : vector<2x4xbf16>, vector<4x16xbf16>, vector<2x16xf32> -> vector<2x16xf32>
    %c0_41 = arith.constant 0 : index
    %c0_42 = arith.constant 0 : index
    %108 = vector.load %arg10[%c0_41, %c0_42] : memref<1x16xf32, #tpu.memory_space<vmem>>, vector<1x16xf32>
    %109 = vector.broadcast %108 : vector<1x16xf32> to vector<2x16xf32>
    %110 = arith.addf %107, %109 : vector<2x16xf32>
    %cst_43 = arith.constant 3.000000e+00 : f32
    %111 = vector.broadcast %cst_43 : f32 to vector<2x16xf32>
    %112 = arith.addf %110, %111 : vector<2x16xf32>
    %cst_44 = arith.constant 0.000000e+00 : f32
    %113 = vector.broadcast %cst_44 : f32 to vector<2x16xf32>
    %114 = arith.maximumf %112, %113 : vector<2x16xf32>
    %cst_45 = arith.constant 6.000000e+00 : f32
    %115 = vector.broadcast %cst_45 : f32 to vector<2x16xf32>
    %116 = arith.minimumf %114, %115 : vector<2x16xf32>
    %cst_46 = arith.constant 0.166666672 : f32
    %117 = vector.broadcast %cst_46 : f32 to vector<2x16xf32>
    %118 = arith.mulf %116, %117 : vector<2x16xf32>
    %119 = arith.truncf %118 : vector<2x16xf32> to vector<2x16xbf16>
    %c0_47 = arith.constant 0 : index
    %c0_48 = arith.constant 0 : index
    %120 = vector.load %arg11[%c0_47, %c0_48] : memref<16x256xbf16, #tpu.memory_space<vmem>>, vector<16x256xbf16>
    %cst_49 = arith.constant dense<0.000000e+00> : vector<2x256xf32>
    %121 = tpu.matmul %119, %120, %cst_49 {dimension_numbers = #tpu.dot_dimension_numbers<[1], [0], [0], [1], [0, 0, 1, 1], [], []>} : vector<2x16xbf16>, vector<16x256xbf16>, vector<2x256xf32> -> vector<2x256xf32>
    %122 = vector.shape_cast %121 : vector<2x256xf32> to vector<2x1x256xf32>
    %123 = vector.broadcast %122 : vector<2x1x256xf32> to vector<2x16x256xf32>
    %124 = arith.mulf %90, %123 : vector<2x16x256xf32>
    %125 = vector.shape_cast %124 : vector<2x16x256xf32> to vector<32x256xf32>
    %126 = arith.truncf %125 : vector<32x256xf32> to vector<32x256xbf16>
    %c0_50 = arith.constant 0 : index
    %c0_51 = arith.constant 0 : index
    %127 = vector.load %arg12[%c0_50, %c0_51] : memref<256x128xbf16, #tpu.memory_space<vmem>>, vector<256x128xbf16>
    %cst_52 = arith.constant dense<0.000000e+00> : vector<32x128xf32>
    %128 = tpu.matmul %126, %127, %cst_52 {dimension_numbers = #tpu.dot_dimension_numbers<[1], [0], [0], [1], [0, 0, 1, 1], [], []>} : vector<32x256xbf16>, vector<256x128xbf16>, vector<32x128xf32> -> vector<32x128xf32>
    %c0_53 = arith.constant 0 : index
    %c0_54 = arith.constant 0 : index
    %129 = vector.load %arg13[%c0_53, %c0_54] : memref<1x128xf32, #tpu.memory_space<vmem>>, vector<1x128xf32>
    %130 = vector.broadcast %129 : vector<1x128xf32> to vector<32x128xf32>
    %131 = arith.addf %128, %130 : vector<32x128xf32>
    %132 = arith.extf %1 : vector<32x128xbf16> to vector<32x128xf32>
    %133 = arith.addf %131, %132 : vector<32x128xf32>
    %134 = vector.shape_cast %133 : vector<32x128xf32> to vector<2x16x128xf32>
    %135 = arith.truncf %134 : vector<2x16x128xf32> to vector<2x16x128xbf16>
    %c0_55 = arith.constant 0 : index
    %c0_56 = arith.constant 0 : index
    %c0_57 = arith.constant 0 : index
    %136 = vector.load %arg14[%c0_55, %c0_56, %c0_57] : memref<2x16x128xbf16, #tpu.memory_space<vmem>>, vector<2x16x128xbf16>
    tpu.vector_store %arg14[%c0_55, %c0_56, %c0_57], %135 {strides = array<i32>} : memref<2x16x128xbf16, #tpu.memory_space<vmem>>, vector<2x16x128xbf16>,
    return
  }
  func.func @transform_0(%arg0: i32) -> (i32, i32, i32) {
    %c0_i32 = arith.constant 0 : i32
    %c0_i32_0 = arith.constant 0 : i32
    %c0_i32_1 = arith.constant 0 : i32
    return %arg0, %c0_i32, %c0_i32_0 : i32, i32, i32
  }
  func.func @transform_1(%arg0: i32) -> (i32, i32) {
    %c0_i32 = arith.constant 0 : i32
    %c0_i32_0 = arith.constant 0 : i32
    %c0_i32_1 = arith.constant 0 : i32
    return %c0_i32, %c0_i32_0 : i32, i32
  }
  func.func @transform_2(%arg0: i32) -> (i32, i32) {
    %c0_i32 = arith.constant 0 : i32
    %c0_i32_0 = arith.constant 0 : i32
    %c0_i32_1 = arith.constant 0 : i32
    return %c0_i32, %c0_i32_0 : i32, i32
  }
  func.func @transform_3(%arg0: i32) -> (i32, i32) {
    %c0_i32 = arith.constant 0 : i32
    %c0_i32_0 = arith.constant 0 : i32
    %c0_i32_1 = arith.constant 0 : i32
    return %c0_i32, %c0_i32_0 : i32, i32
  }
  func.func @transform_4(%arg0: i32) -> (i32, i32) {
    %c0_i32 = arith.constant 0 : i32
    %c0_i32_0 = arith.constant 0 : i32
    %c0_i32_1 = arith.constant 0 : i32
    return %c0_i32, %c0_i32_0 : i32, i32
  }
  func.func @transform_5(%arg0: i32) -> (i32, i32) {
    %c0_i32 = arith.constant 0 : i32
    %c0_i32_0 = arith.constant 0 : i32
    %c0_i32_1 = arith.constant 0 : i32
    return %c0_i32, %c0_i32_0 : i32, i32
  }
  func.func @transform_6(%arg0: i32) -> (i32, i32) {
    %c0_i32 = arith.constant 0 : i32
    %c0_i32_0 = arith.constant 0 : i32
    %c0_i32_1 = arith.constant 0 : i32
    return %c0_i32, %c0_i32_0 : i32, i32
  }
  func.func @transform_7(%arg0: i32) -> (i32, i32) {
    %c0_i32 = arith.constant 0 : i32
    %c0_i32_0 = arith.constant 0 : i32
    %c0_i32_1 = arith.constant 0 : i32
    return %c0_i32, %c0_i32_0 : i32, i32
  }
  func.func @transform_8(%arg0: i32) -> (i32, i32) {
    %c0_i32 = arith.constant 0 : i32
    %c0_i32_0 = arith.constant 0 : i32
    %c0_i32_1 = arith.constant 0 : i32
    return %c0_i32, %c0_i32_0 : i32, i32
  }
  func.func @transform_9(%arg0: i32) -> (i32, i32) {
    %c0_i32 = arith.constant 0 : i32
    %c0_i32_0 = arith.constant 0 : i32
    %c0_i32_1 = arith.constant 0 : i32
    return %c0_i32, %c0_i32_0 : i32, i32
  }
  func.func @transform_10(%arg0: i32) -> (i32, i32) {
    %c0_i32 = arith.constant 0 : i32
    %c0_i32_0 = arith.constant 0 : i32
    %c0_i32_1 = arith.constant 0 : i32
    return %c0_i32, %c0_i32_0 : i32, i32
  }
  func.func @transform_11(%arg0: i32) -> (i32, i32) {
    %c0_i32 = arith.constant 0 : i32
    %c0_i32_0 = arith.constant 0 : i32
    %c0_i32_1 = arith.constant 0 : i32
    return %c0_i32, %c0_i32_0 : i32, i32
  }
  func.func @transform_12(%arg0: i32) -> (i32, i32) {
    %c0_i32 = arith.constant 0 : i32
    %c0_i32_0 = arith.constant 0 : i32
    %c0_i32_1 = arith.constant 0 : i32
    return %c0_i32, %c0_i32_0 : i32, i32
  }
  func.func @transform_13(%arg0: i32) -> (i32, i32, i32) {
    %c0_i32 = arith.constant 0 : i32
    %c0_i32_0 = arith.constant 0 : i32
    %c0_i32_1 = arith.constant 0 : i32
    return %arg0, %c0_i32, %c0_i32_0 : i32, i32, i32
  }
}

</mosaic_0001>

<bundles_post_ra>
// kernel: tpu_custom_call.1
= control target key start
LH: loop header
LB: loop body
LE: loop exit
PB: predicated region body
PF: predicated region fallthrough
CT: control target
= control target key end

     0   :  { %v2418_v2 = vmov 0   ;;  %v84_v11 = vlaneseq  ;;  %s2419_s22 = smov 32   ;;  %s2420_s29 = smov 16   ;;  %s3799_s0 = inlined_call_operand.vmem [shape: bf16[2,16,128], index: 0, kind: input, shape index: {}]   ;;  %s3800_s1 = inlined_call_operand.vmem [shape: bf16[128,288], index: 1, kind: input, shape index: {}]   ;;  %s3801_s2 = inlined_call_operand.vmem [shape: f32[1,288], index: 2, kind: input, shape index: {}]   ;;  %s3802_s3 = inlined_call_operand.vmem [shape: f32[9,256], index: 3, kind: input, shape index: {}]   ;;  %s3803_s4 = inlined_call_operand.vmem [shape: f32[1,256], index: 4, kind: input, shape index: {}]   ;;  %s3804_s5 = inlined_call_operand.vmem [shape: bf16[256,16], index: 5, kind: input, shape index: {}]   ;;  %s3805_s6 = inlined_call_operand.vmem [shape: bf16[16,4], index: 6, kind: input, shape index: {}]   ;;  %s3806_s7 = inlined_call_operand.vmem [shape: f32[1,4], index: 7, kind: input, shape index: {}]   ;;  %s3807_s8 = inlined_call_operand.vmem [shape: bf16[4,16], index: 8, kind: input, shape index: {}]   ;;  %s3808_s9 = inlined_call_operand.vmem [shape: f32[1,16], index: 9, kind: input, shape index: {}]   ;;  %s3809_s10 = inlined_call_operand.vmem [shape: bf16[16,256], index: 10, kind: input, shape index: {}]   ;;  %s3810_s11 = inlined_call_operand.vmem [shape: bf16[256,128], index: 11, kind: input, shape index: {}]   ;;  %s3811_s12 = inlined_call_operand.vmem [shape: f32[1,128], index: 12, kind: input, shape index: {}]   ;;  %s3812_s13 = inlined_call_operand.hbm [shape: bf16[2,16,128], index: 13, kind: output, shape index: {}]  }
   0x1   :  { %v2320_v0 = vld [vmem:[%s3800_s1 + $0x4] ss:$12 sps:$4 sm:$0xff]   ;;  %v2322_v1 = vld [vmem:[%s3800_s1 + $0x8] ss:$12 sps:$4 sm:$0xff]   ;;  %271 = vmatprep.mubr.bf16.mxu0 %v2418_v2  ;;  %v2323_v3 = vld [vmem:[%s3800_s1] ss:$12 sps:$4 sm:$0xff]  }
   0x2   :  { %239 = vmatprep.subr.bf16.mxu0 %v2320_v0  ;;  %2277 = vmatprep.subr.bf16.mxu1 %v2322_v1  ;;  %v2324_v4 = vld [vmem:[%s3800_s1 + $0x1c] ss:$12 sps:$4 sm:$0xff]   ;;  %v2326_v5 = vld [vmem:[%s3800_s1 + $0x20] ss:$12 sps:$4 sm:$0xff]   ;;  %v2327_v6 = vld [vmem:[%s3800_s1 + $0x18] ss:$12 sps:$4 sm:$0xff]  }
   0x3   :  { %240 = vmatpush1.bf16.msra.mxu0 %v2323_v3  ;;  %2278 = vmatpush3.bf16.msra.mxu1 %v2322_v1  ;;  %v2328_v7 = vld [vmem:[%s3800_s1 + $0x34] ss:$12 sps:$4 sm:$0xff]   ;;  %v2330_v8 = vld [vmem:[%s3800_s1 + $0x38] ss:$12 sps:$4 sm:$0xff]   ;;  %v2331_v9 = vld [vmem:[%s3800_s1 + $0x30] ss:$12 sps:$4 sm:$0xff]  }
   0x4   :  { %241 = vmatprep.subr.bf16.mxu0 %v2324_v4  ;;  %2279 = vmatprep.subr.bf16.mxu1 %v2326_v5  ;;  %v2332_v10 = vld [vmem:[%s3800_s1 + $0x4c] ss:$12 sps:$4 sm:$0xff]   ;;  %v2334_v12 = vld [vmem:[%s3800_s1 + $0x50] ss:$12 sps:$4 sm:$0xff]   ;;  %v2335_v13 = vld [vmem:[%s3800_s1 + $0x48] ss:$12 sps:$4 sm:$0xff]  }
   0x5   :  { %v2536_v14 = vshrl.u32 %v84_v11, 7  ;;  %v2336_v15 = vld [vmem:[%s3800_s1 + $0x64] ss:$12 sps:$4 sm:$0xff]   ;;  %v2338_v16 = vld [vmem:[%s3800_s1 + $0x68] ss:$12 sps:$4 sm:$0xff]  }
   0x6   :  { %v2339_v17 = vld [vmem:[%s3800_s1 + $0x60] ss:$12 sps:$4 sm:$0xff]   ;;  %v2340_v18 = vld [vmem:[%s3800_s1 + $0x7c] ss:$12 sps:$4 sm:$0xff]   ;;  %v2343_v24 = vld [vmem:[%s3800_s1 + $0x78] ss:$12 sps:$4 sm:$0xff]  }
   0x7   :  { %242 = vmatpush1.bf16.msra.mxu0 %v2327_v6  ;;  %2280 = vmatpush3.bf16.msra.mxu1 %v2326_v5  ;;  %3840 = vst [vmem:[#allocation5_spill] sm:$0xff] %v2536_v14  ;;  %v2551_v19 = vsub.s32 0, %v2536_v14  ;;  %v2342_v20 = vld [vmem:[%s3800_s1 + $0x80] ss:$12 sps:$4 sm:$0xff]   ;;  %v2560_v22 = vsub.s32 1, %v2536_v14 }
   0x8   :  { %243 = vmatprep.subr.bf16.mxu0 %v2328_v7  ;;  %2281 = vmatprep.subr.bf16.mxu1 %v2330_v8  ;;  %v46_v21 = vld [vmem:[%s3799_s0] sm:$0xff]   ;;  %v2347_v30 = vld [vmem:[%s3800_s1 + $0x90] ss:$12 sps:$4 sm:$0xff]   ;;  %v2348_v33 = vld [vmem:[%s3800_s1 + $0xac] ss:$12 sps:$4 sm:$0xff]  }
   0x9   :  { %3841 = vst [vmem:[#allocation6_spill] sm:$0xff] %v2551_v19  ;;  %3842 = vst [vmem:[#allocation7_spill] sm:$0xff] %v2560_v22  ;;  %v2146_v23 = vld [vmem:[%s3802_s3 + $0x2] ss:$8 sm:$0x3]  ;;  %2293 = vmatprep.mubr.bf16.mxu1 %v46_v21 }
   0xa   :  { %v613_v25 = vrot.slane %v2146_v23, %v2551_v19  ;;  %v2145_v26 = vld [vmem:[%s3802_s3 + $0x1] ss:$8 sm:$0x3]  ;;  %v2346_v28 = vld [vmem:[%s3800_s1 + $0x98] ss:$12 sps:$4 sm:$0xff]   ;;  %v617_v31 = vrot.slane %v2146_v23, %v2560_v22 }
   0xb   :  { %244 = vmatpush1.bf16.msra.mxu0 %v2331_v9  ;;  %2282 = vmatpush3.bf16.msra.mxu1 %v2330_v8  ;;  %v2344_v27 = vld [vmem:[%s3800_s1 + $0x94] ss:$12 sps:$4 sm:$0xff]   ;;  %v520_v29 = vrot.slane %v2145_v26, %v2551_v19  ;;  %v2148_v32 = vld [vmem:[%s3802_s3 + $0x4] ss:$8 sm:$0x3]  ;;  %v524_v35 = vrot.slane %v2145_v26, %v2560_v22 }
   0xc   :  { %245 = vmatprep.subr.bf16.mxu0 %v2332_v10  ;;  %2283 = vmatprep.subr.bf16.mxu1 %v2334_v12  ;;  %v2350_v34 = vld [vmem:[%s3800_s1 + $0xb0] ss:$12 sps:$4 sm:$0xff]   ;;  %v2149_v36 = vld [vmem:[%s3802_s3 + $0x5] ss:$8 sm:$0x3]  ;;  %v784_v39 = vrot.slane %v2148_v32, %v2560_v22  ;;  %v780_v40 = vrot.slane %v2148_v32, %v2551_v19 }
   0xd   :  { %618 = vrot.lane.b32.xlu1 %v613_v25, %s2419_s22  ;;  %525 = vrot.lane.b32.xlu0 %v520_v29, %s2420_s29  ;;  %v2351_v37 = vld [vmem:[%s3800_s1 + $0xa8] ss:$12 sps:$4 sm:$0xff]   ;;  %v2151_v41 = vld [vmem:[%s3802_s3 + $0x7] ss:$8 sm:$0x3]  ;;  %v917_v42 = vrot.slane %v2149_v36, %v2560_v22  ;;  %v913_v43 = vrot.slane %v2149_v36, %v2551_v19 }
   0xe   :  { %v48_v38 = vld [vmem:[%s3799_s0 + $0x8] sm:$0xff]   ;;  %v2152_v44 = vld [vmem:[%s3802_s3 + $0x10] ss:$8 sm:$0x3]  ;;  %v1124_v45 = vrot.slane %v2151_v41, %v2560_v22  ;;  %v1120_v46 = vrot.slane %v2151_v41, %v2551_v19 }
   0xf   :  { %246 = vmatpush1.bf16.msra.mxu0 %v2335_v13  ;;  %2284 = vmatpush3.bf16.msra.mxu1 %v2334_v12  ;;  %v1257_v47 = vrot.slane %v2152_v44, %v2560_v22  ;;  %v1253_v48 = vrot.slane %v2152_v44, %v2551_v19 }
  0x10   :  { %247 = vmatprep.subr.bf16.mxu0 %v2336_v15  ;;  %2285 = vmatprep.subr.bf16.mxu1 %v2338_v16 }
  0x11   :  { %620 = vrot.lane.b32.xlu1 %v617_v31, %s2419_s22  ;;  %527 = vrot.lane.b32.xlu0 %v524_v35, %s2420_s29 }
  0x13   :  { %248 = vmatpush1.bf16.msra.mxu0 %v2339_v17  ;;  %2286 = vmatpush3.bf16.msra.mxu1 %v2338_v16 }
  0x14   :  { %249 = vmatprep.subr.bf16.mxu0 %v2340_v18  ;;  %2287 = vmatprep.subr.bf16.mxu1 %v2342_v20 }
  0x15   :  { %787 = vrot.lane.b32.xlu1 %v784_v39, %s2420_s29  ;;  %785 = vrot.lane.b32.xlu0 %v780_v40, %s2420_s29 }
  0x17   :  { %250 = vmatpush1.bf16.msra.mxu0 %v2343_v24  ;;  %2288 = vmatpush3.bf16.msra.mxu1 %v2342_v20 }
  0x18   :  { %251 = vmatprep.subr.bf16.mxu0 %v2344_v27  ;;  %2289 = vmatprep.subr.bf16.mxu1 %v2346_v28 }
  0x19   :  { %920 = vrot.lane.b32.xlu1 %v917_v42, %s2419_s22  ;;  %918 = vrot.lane.b32.xlu0 %v913_v43, %s2419_s22 }
  0x1b   :  { %252 = vmatpush1.bf16.msra.mxu0 %v2347_v30  ;;  %2290 = vmatpush3.bf16.msra.mxu1 %v2346_v28 }
  0x1c   :  { %253 = vmatprep.subr.bf16.mxu0 %v2348_v33  ;;  %2291 = vmatprep.subr.bf16.mxu1 %v2350_v34 }
  0x1d   :  { %1127 = vrot.lane.b32.xlu1 %v1124_v45, %s2420_s29  ;;  %1125 = vrot.lane.b32.xlu0 %v1120_v46, %s2420_s29 }
  0x1f   :  { %254 = vmatpush1.bf16.msra.mxu0 %v2351_v37  ;;  %2292 = vmatpush3.bf16.msra.mxu1 %v2350_v34 }
  0x21   :  { %1260 = vrot.lane.b32.xlu1 %v1257_v47, %s2419_s22  ;;  %1258 = vrot.lane.b32.xlu0 %v1253_v48, %s2419_s22 }
  0x22   :  { %272 = vmatmul.mubr.bf16.vlgmr.msra.gmra.mrb[0].mxu0 %v46_v21  ;;  %2294 = vmatmul.mubr.bf16.vlgmr.msra.gmra.mrb[0].mxu1 %v48_v38 }
  0x23   :  { %281 = vmatprep.mubr.bf16.mxu0 %v2418_v2  ;;  %1825 = vmatprep.mubr.bf16.mxu1 %v2418_v2 }
  0x2a   :  { %282 = vmatmul.mubr.bf16.gmra.mrb[4].mxu0 %v48_v38 }
  0x2b   :  { %18 = vsyncpa [#allocation3], 0  ;;  %v94_v53 = vsub.s32 2, %v2536_v14  ;;  %v82_v56 = vld [vmem:[%s3801_s2] sm:$0x7]  ;;  %vm529_vm0 = vcmask 130048  }
  0x2c   :  { %v2647_v57 = vrot.slane %v82_v56, %v2551_v19  ;;  %v2650_v59 = vrot.slane %v82_v56, %v2560_v22  ;;  %vm622_vm1 = vcmask 261120   ;;  %vm425_vm2 = vcmask 1040384   ;;  %s2421_s25 = smov 112   ;;  %s2422_s26 = smov 96  }
  0x2d   :  { %v95_v58 = vrot.slane %v82_v56, %v94_v53  ;;  %vm737_vm3 = vcmask 1046528   ;;  %vm1077_vm4 = vcmask 1045504   ;;  %vm582_vm5 = vcmask 916480  }
  0x2e   :  { %vm675_vm6 = vcmask 785408   ;;  %vm1512_vm7 = vcmask 1041409   ;;  %vm2424_vm8 = vmmov 0   ;;  %vm1729_vm9 = vcmask 1041408  }
  0x2f   :  { %vm1725_vm10 = vcmask 31744  }
  0x7f   :  { %v2630_v49 = vpop.permute.xlu1 %618  ;;  %v2632_v50 = vpop.permute.xlu0 %525 }
  0x80   :  { %3843 = vst [vmem:[#allocation8_spill] sm:$0xff] %v2630_v49  ;;  %3844 = vst [vmem:[#allocation9_spill] sm:$0xff] %v2632_v50 }
  0x83   :  { %v2634_v51 = vpop.permute.xlu1 %620  ;;  %v2636_v52 = vpop.permute.xlu0 %527 }
  0x87   :  { %v2639_v54 = vpop.permute.xlu1 %787  ;;  %v2641_v55 = vpop.permute.xlu0 %785 }
  0x8b   :  { %v2652_v60 = vpop.permute.xlu1 %920  ;;  %v2654_v61 = vpop.permute.xlu0 %918 }
  0x8f   :  { %v2660_v33 = vpop.permute.xlu1 %1127  ;;  %v2662_v34 = vpop.permute.xlu0 %1125 }
  0xf5   :  { %v273_v62 = vpop.f32.mrb[0].mxu0  ;;  %v2295_v63 = vpop.f32.mrb[0].mxu1 }
  0xf6   :  { %v274_v0 = vadd.f32 %v273_v62, %v2647_v57  ;;  %v335_v1 = vadd.f32 %v2295_v63, %v95_v58  ;;  %v275_v2 = vpop.f32.mrb[1].mxu0  ;;  %v326_v3 = vpop.f32.mrb[1].mxu1 }
  0xf7   :  { %v276_v4 = vadd.f32 %v275_v2, %v2650_v59  ;;  %v327_v5 = vadd.f32 %v326_v3, %v95_v58  ;;  %v277_v6 = vpop.f32.mrb[2].mxu0  ;;  %v2296_v7 = vpop.f32.mrb[2].mxu1 }
  0xf8   :  { %v341_v8 = vadd.f32 3.0, %v274_v0  ;;  %v349_v9 = vadd.f32 3.0, %v335_v1  ;;  %v278_v10 = vadd.f32 %v277_v6, %v2647_v57  ;;  %v338_v11 = vadd.f32 %v2296_v7, %v95_v58  ;;  %v279_v12 = vpop.f32.mrb[3].mxu0  ;;  %v329_v13 = vpop.f32.mrb[3].mxu1 }
  0xf9   :  { %v342_v15 = vadd.f32 3.0, %v276_v4  ;;  %v343_v16 = vadd.f32 3.0, %v327_v5  ;;  %v280_v17 = vadd.f32 %v279_v12, %v2650_v59  ;;  %v330_v18 = vadd.f32 %v329_v13, %v95_v58 }
  0xfa   :  { %v353_v20 = vmax.f32 %v341_v8, 0.0  ;;  %v361_v21 = vmax.f32 %v349_v9, 0.0  ;;  %v344_v23 = vadd.f32 3.0, %v278_v10  ;;  %v352_v24 = vadd.f32 3.0, %v338_v11  ;;  %v2664_v8 = vpop.permute.xlu1 %1260 }
  0xfb   :  { %v354_v25 = vmax.f32 %v342_v15, 0.0  ;;  %v355_v26 = vmax.f32 %v343_v16, 0.0  ;;  %v345_v27 = vadd.f32 3.0, %v280_v17  ;;  %v346_v28 = vadd.f32 3.0, %v330_v18 }
  0xfc   :  { %v365_v29 = vmin.f32 %v353_v20, 6.0  ;;  %v373_v30 = vmin.f32 %v361_v21, 6.0  ;;  %v356_v31 = vmax.f32 %v344_v23, 0.0  ;;  %v364_v32 = vmax.f32 %v352_v24, 0.0 }
  0xfd   :  { %v366_v35 = vmin.f32 %v354_v25, 6.0  ;;  %v367_v36 = vmin.f32 %v355_v26, 6.0  ;;  %v357_v37 = vmax.f32 %v345_v27, 0.0  ;;  %v358_v38 = vmax.f32 %v346_v28, 0.0  ;;  %v283_v39 = vpop.f32.mrb[4].mxu0 }
  0xfe   :  { %v377_v40 = vmul.f32 %v365_v29, %v274_v0  ;;  %v385_v41 = vmul.f32 %v373_v30, %v335_v1  ;;  %v368_v42 = vmin.f32 %v356_v31, 6.0  ;;  %v376_v43 = vmin.f32 %v364_v32, 6.0  ;;  %v285_v44 = vpop.f32.mrb[5].mxu0  ;;  %v2666_v0 = vpop.permute.xlu0 %1258 }
  0xff   :  { %v378_v45 = vmul.f32 %v366_v35, %v276_v4  ;;  %v379_v46 = vmul.f32 %v367_v36, %v327_v5  ;;  %v369_v47 = vmin.f32 %v357_v37, 6.0  ;;  %v370_v48 = vmin.f32 %v358_v38, 6.0  ;;  %v287_v53 = vpop.f32.mrb[6].mxu0 }
 0x100   :  { %v389_v56 = vmul.f32 0.16666667, %v377_v40  ;;  %v397_v58 = vmul.f32 0.16666667, %v385_v41  ;;  %v380_v62 = vmul.f32 %v368_v42, %v278_v10  ;;  %v388_v63 = vmul.f32 %v376_v43, %v338_v11  ;;  %v289_v2 = vpop.f32.mrb[7].mxu0 }
 0x101   :  { %v381_v3 = vmul.f32 %v369_v47, %v280_v17  ;;  %v382_v6 = vmul.f32 %v370_v48, %v330_v18  ;;  %v390_v7 = vmul.f32 0.16666667, %v378_v45  ;;  %v2671_v1 = vsel %vm529_vm0, %v2632_v50, %v2636_v52  ;;  %v2731_v47 = vld [vmem:[%s3802_s3 + $0x3] ss:$8 sm:$0x3] }
 0x102   :  { %v2676_v4 = vsel %vm622_vm1, %v2630_v49, %v2634_v51  ;;  %v407_v5 = vrot.slane %v389_v56, 1  ;;  %v426_v9 = vrot.slane %v389_v56, 7  ;;  %v391_v10 = vmul.f32 0.16666667, %v379_v46  ;;  %3846 = vst [vmem:[#allocation11_spill] sm:$0xff] %v2731_v47 }
 0x103   :  { %v2681_v11 = vsel %vm622_vm1, %v2654_v61, %v2652_v60  ;;  %v412_v12 = vrot.slane %v397_v58, 1  ;;  %v437_v13 = vrot.slane %v397_v58, 7  ;;  %v2683_v15 = vmul.f32 0.16666667, %v380_v62 }
 0x104   :  { %v400_v16 = vmul.f32 0.16666667, %v388_v63  ;;  %v2685_v17 = vmul.f32 0.16666667, %v381_v3  ;;  %v394_v18 = vmul.f32 0.16666667, %v382_v6  ;;  %v2690_v20 = vsel %vm622_vm1, %v2666_v0, %v2664_v8 }
 0x105   :  { %v2695_v21 = vsel %vm529_vm0, %v2641_v55, %v2639_v54  ;;  %v408_v23 = vrot.slane %v390_v7, 1  ;;  %v427_v24 = vrot.slane %v390_v7, 7  ;;  %v429_v25 = vrot.slane %v2683_v15, 7 }
 0x106   :  { %v442_v26 = vrot.slane %v400_v16, 7  ;;  %v428_v27 = vrot.slane %v391_v10, 7  ;;  %v3815_v28 = vrot.slane %v2685_v17, 7  ;;  %v433_v29 = vrot.slane %v394_v18, 7 }
 0x107   :  { %v464_v30 = vrot.slane %v394_v18, 5  ;;  %v2700_v31 = vsel %vm425_vm2, %v407_v5, %v426_v9  ;;  %v2703_v32 = vsel %vm425_vm2, %v412_v12, %v437_v13  ;;  %v2708_v35 = vsel %vm425_vm2, %v426_v9, %v429_v25 }
 0x108   :  { %3845 = vst [vmem:[#allocation10_spill] sm:$0xff] %v2708_v35  ;;  %v2711_v36 = vsel %vm425_vm2, %v437_v13, %v442_v26  ;;  %v409_v37 = vrot.slane %v391_v10, 1  ;;  %v2716_v38 = vsel %vm425_vm2, %v427_v24, %v3815_v28  ;;  %v2719_v40 = vsel %vm425_vm2, %v428_v27, %v433_v29 }
 0x109   :  { %v2722_v41 = vsel %vm425_vm2, %v433_v29, %v464_v30  ;;  %v284_v42 = vadd.f32 %v283_v39, %v2647_v57  ;;  %v286_v43 = vadd.f32 %v285_v44, %v2650_v59  ;;  %v288_v45 = vadd.f32 %v287_v53, %v2647_v57 }
 0x10a   :  { %v290_v46 = vadd.f32 %v289_v2, %v2650_v59  ;;  %v467_v48 = vrot.slane %v400_v16, 5  ;;  %v542_v56 = vmul.f32 %v2636_v52, %v2703_v32  ;;  %v534_v58 = vmul.f32 %v2632_v50, %v2700_v31 }
 0x10b   :  { %v2740_v39 = vsel %vm529_vm0, %v2662_v34, %v2660_v33  ;;  %v347_v57 = vadd.f32 3.0, %v284_v42  ;;  %v348_v44 = vadd.f32 3.0, %v286_v43  ;;  %v350_v59 = vadd.f32 3.0, %v288_v45 }
 0x10c   :  { %v351_v53 = vadd.f32 3.0, %v290_v46  ;;  %v2743_v62 = vsel %vm425_vm2, %v408_v23, %v427_v24  ;;  %v2746_v63 = vsel %vm425_vm2, %v409_v37, %v428_v27  ;;  %574 = vrot.lane.b32.xlu1 %v542_v56, %s2421_s25  ;;  %558 = vrot.lane.b32.xlu0 %v534_v58, %s2421_s25  ;;  %v2752_v2 = vrot.slane %v2731_v47, %v2551_v19 }
 0x10d   :  { %3847 = vst [vmem:[#allocation12_spill] sm:$0xff] %v2743_v62  ;;  %v359_v3 = vmax.f32 %v347_v57, 0.0  ;;  %v360_v6 = vmax.f32 %v348_v44, 0.0  ;;  %v362_v7 = vmax.f32 %v350_v59, 0.0  ;;  %v462_v9 = vrot.slane %v2683_v15, 5 }
 0x10e   :  { %3848 = vst [vmem:[#allocation13_spill] sm:$0xff] %v2752_v2  ;;  %v363_v5 = vmax.f32 %v351_v53, 0.0  ;;  %v2756_v10 = vsel %vm425_vm2, %v442_v26, %v467_v48  ;;  %v635_v12 = vmul.f32 %v2634_v51, %v2703_v32  ;;  %v627_v13 = vmul.f32 %v2630_v49, %v2700_v31 }
 0x10f   :  { %v371_v16 = vmin.f32 %v359_v3, 6.0  ;;  %v372_v18 = vmin.f32 %v360_v6, 6.0  ;;  %v374_v23 = vmin.f32 %v362_v7, 6.0  ;;  %v463_v27 = vrot.slane %v2685_v17, 5 }
 0x110   :  { %v375_v24 = vmin.f32 %v363_v5, 6.0  ;;  %667 = vrot.lane.b32.xlu1 %v635_v12, %s2422_s26  ;;  %651 = vrot.lane.b32.xlu0 %v627_v13, %s2422_s26  ;;  %v536_v26 = vmul.f32 %v2636_v52, %v2746_v63  ;;  %v535_v29 = vmul.f32 %v2671_v1, %v2743_v62  ;;  %v793_v30 = vmul.f32 %v2641_v55, %v2700_v31 }
 0x111   :  { %v383_v37 = vmul.f32 %v371_v16, %v284_v42  ;;  %v384_v48 = vmul.f32 %v372_v18, %v286_v43  ;;  %v386_v56 = vmul.f32 %v374_v23, %v288_v45  ;;  %v629_v57 = vmul.f32 %v2634_v51, %v2746_v63 }
 0x112   :  { %v387_v58 = vmul.f32 %v375_v24, %v290_v46  ;;  %v628_v44 = vmul.f32 %v2676_v4, %v2743_v62  ;;  %v2777_v59 = vmul.f32 %v2641_v55, %v2708_v35  ;;  %v926_v53 = vmul.f32 %v2654_v61, %v2700_v31 }
 0x113   :  { %v395_v3 = vmul.f32 0.16666667, %v383_v37  ;;  %v396_v6 = vmul.f32 0.16666667, %v384_v48  ;;  %v398_v42 = vmul.f32 0.16666667, %v386_v56  ;;  %v2783_v43 = vmul.f32 %v2654_v61, %v2708_v35 }
 0x114   :  { %v399_v45 = vmul.f32 0.16666667, %v387_v58  ;;  %562 = vrot.lane.b32.xlu1 %v536_v26, %s2421_s25  ;;  %560 = vrot.lane.b32.xlu0 %v535_v29, %s2421_s25  ;;  %v829_v46 = vrot.slane %v793_v30, 1  ;;  %v3814_v7 = vrot.slane %v2777_v59, 1  ;;  %v962_v5 = vrot.slane %v926_v53, 1 }
 0x115   :  { %v410_v12 = vrot.slane %v395_v3, 1  ;;  %v435_v13 = vrot.slane %v395_v3, 7  ;;  %v411_v16 = vrot.slane %v396_v6, 1  ;;  %v436_v18 = vrot.slane %v396_v6, 7 }
 0x116   :  { %v438_v23 = vrot.slane %v398_v42, 7  ;;  %v465_v24 = vrot.slane %v398_v42, 5  ;;  %v440_v37 = vrot.slane %v399_v45, 7  ;;  %v466_v48 = vrot.slane %v399_v45, 5 }
 0x117   :  { %v2789_v56 = vsel %vm425_vm2, %v410_v12, %v435_v13  ;;  %v2792_v58 = vsel %vm425_vm2, %v411_v16, %v436_v18  ;;  %v831_v26 = vsel %vm737_vm3, %v829_v46, %v3814_v7  ;;  %v3813_v29 = vrot.slane %v2783_v43, 1  ;;  %v2838_v16 = vld [vmem:[%s3802_s3 + $0x6] ss:$8 sm:$0x3] }
 0x118   :  { %3849 = vst [vmem:[#allocation14_spill] sm:$0xff] %v2792_v58  ;;  %v2799_v30 = vsel %vm425_vm2, %v435_v13, %v438_v23  ;;  %v2802_v53 = vsel %vm425_vm2, %v438_v23, %v465_v24  ;;  %v2805_v3 = vsel %vm425_vm2, %v436_v18, %v440_v37  ;;  %v2808_v6 = vsel %vm425_vm2, %v440_v37, %v466_v48 }
 0x119   :  { %655 = vrot.lane.b32.xlu1 %v629_v57, %s2422_s26  ;;  %653 = vrot.lane.b32.xlu0 %v628_v44, %s2422_s26  ;;  %v545_v42 = vmul.f32 %v2636_v52, %v2711_v36  ;;  %v2817_v45 = vsel %vm737_vm3, %v962_v5, %v3813_v29  ;;  %v1133_v46 = vmul.f32 %v2662_v34, %v2700_v31  ;;  %v3851_v15 = vrot.slane %v2685_v17, 7 }
 0x11a   :  { %v2823_v12 = vmul.f32 %v2662_v34, %v2708_v35  ;;  %v1266_v57 = vmul.f32 %v2666_v0, %v2700_v31  ;;  %v2829_v44 = vmul.f32 %v2666_v0, %v2708_v35  ;;  %v804_v13 = vmul.f32 %v2639_v54, %v2703_v32  ;;  %3850 = vst [vmem:[#allocation15_spill] sm:$0xff] %v2838_v16 }
 0x11b   :  { %v807_v5 = vmul.f32 %v2639_v54, %v2711_v36  ;;  %v2843_v18 = vsel %vm425_vm2, %v429_v25, %v462_v9  ;;  %v538_v23 = vmul.f32 %v2671_v1, %v2716_v38  ;;  %v1169_v24 = vrot.slane %v1133_v46, 2 }
 0x11c   :  { %v3817_v37 = vrot.slane %v2823_v12, 2  ;;  %v1302_v48 = vrot.slane %v1266_v57, 2  ;;  %v3816_v29 = vrot.slane %v2829_v44, 2  ;;  %v850_v7 = vrot.slane %v804_v13, 1 }
 0x11d   :  { %580 = vrot.lane.b32.xlu1 %v545_v42, %s2421_s25  ;;  %v851_v28 = vrot.slane %v807_v5, 1  ;;  %v2855_v25 = vsel %vm425_vm2, %v3851_v15, %v463_v27  ;;  %566 = vrot.lane.b32.xlu0 %v538_v23, %s2421_s25  ;;  %v810_v42 = vmul.f32 %v2639_v54, %v2756_v10  ;;  %v2867_v46 = vrot.slane %v2838_v16, %v2551_v19 }
 0x11e   :  { %v2861_v9 = vsel %vm1077_vm4, %v1169_v24, %v3817_v37  ;;  %v537_v17 = vmul.f32 %v2632_v50, %v2708_v35  ;;  %v2874_v27 = vsel %vm1077_vm4, %v1302_v48, %v3816_v29  ;;  %v799_v13 = vmul.f32 %v2641_v55, %v2843_v18 }
 0x11f   :  { %3852 = vst [vmem:[#allocation16_spill] sm:$0xff] %v2867_v46  ;;  %v2877_v57 = vsel %vm737_vm3, %v850_v7, %v851_v28  ;;  %v631_v5 = vmul.f32 %v2676_v4, %v2716_v38  ;;  %v638_v23 = vmul.f32 %v2634_v51, %v2711_v36  ;;  %v797_v24 = vmul.f32 %v2695_v21, %v2716_v38 }
 0x120   :  { %v857_v15 = vrot.slane %v810_v42, 1  ;;  %v800_v48 = vmul.f32 %v2695_v21, %v2855_v25  ;;  %v838_v7 = vrot.slane %v799_v13, 1  ;;  %v937_v29 = vmul.f32 %v2652_v60, %v2703_v32 }
 0x121   :  { %564 = vrot.lane.b32.xlu1 %v537_v17, %s2421_s25  ;;  %v940_v37 = vmul.f32 %v2652_v60, %v2711_v36  ;;  %659 = vrot.lane.b32.xlu0 %v631_v5, %s2422_s26  ;;  %v630_v14 = vmul.f32 %v2630_v49, %v2708_v35  ;;  %v930_v42 = vmul.f32 %v2681_v11, %v2716_v38  ;;  %v3853_v50 = vrot.slane %v2777_v59, 1 }
 0x122   :  { %v2898_v19 = vsel %vm737_vm3, %v851_v28, %v857_v15  ;;  %v933_v17 = vmul.f32 %v2681_v11, %v2855_v25  ;;  %v794_v13 = vmul.f32 %v2695_v21, %v2743_v62  ;;  %v983_v5 = vrot.slane %v937_v29, 1 }
 0x123   :  { %v2909_v47 = vsel %vm737_vm3, %v3853_v50, %v838_v7  ;;  %v984_v16 = vrot.slane %v940_v37, 1  ;;  %v539_v28 = vmul.f32 %v2636_v52, %v2719_v40  ;;  %v632_v15 = vmul.f32 %v2634_v51, %v2719_v40 }
 0x124   :  { %v927_v49 = vmul.f32 %v2681_v11, %v2743_v62  ;;  %v943_v22 = vmul.f32 %v2652_v60, %v2756_v10  ;;  %v833_v59 = vrot.slane %v797_v24, 1  ;;  %v840_v46 = vrot.slane %v800_v48, 1 }
 0x125   :  { %673 = vrot.lane.b32.xlu1 %v638_v23, %s2422_s26  ;;  %v2921_v50 = vsel %vm737_vm3, %v983_v5, %v984_v16  ;;  %v932_v29 = vmul.f32 %v2654_v61, %v2843_v18  ;;  %859 = vrot.lane.b32.xlu0 %v831_v26, %s2421_s25  ;;  %v966_v52 = vrot.slane %v930_v42, 1  ;;  %v973_v51 = vrot.slane %v933_v17, 1 }
 0x126   :  { %v990_v37 = vrot.slane %v943_v22, 1  ;;  %v1144_v7 = vmul.f32 %v2660_v33, %v2703_v32  ;;  %v832_v35 = vrot.slane %v794_v13, 1  ;;  %v2930_v23 = vmul.f32 %v2740_v39, %v2743_v62 }
 0x127   :  { %v971_v24 = vrot.slane %v932_v29, 1  ;;  %v1147_v48 = vmul.f32 %v2660_v33, %v2711_v36  ;;  %v965_v5 = vrot.slane %v927_v49, 1  ;;  %v2939_v26 = vmul.f32 %v2740_v39, %v2716_v38 }
 0x128   :  { %v2935_v2 = vsel %vm737_vm3, %v984_v16, %v990_v37  ;;  %v2943_v22 = vmul.f32 %v2740_v39, %v2855_v25  ;;  %v834_v42 = vsel %vm737_vm3, %v832_v35, %v833_v59  ;;  %v3854_v17 = vrot.slane %v2783_v43, 1 }
 0x129   :  { %657 = vrot.lane.b32.xlu1 %v630_v14, %s2422_s26  ;;  %v1190_v49 = vrot.slane %v1144_v7, 2  ;;  %v1191_v16 = vrot.slane %v1147_v48, 2  ;;  %992 = vrot.lane.b32.xlu0 %v2817_v45, %s2422_s26  ;;  %v2955_v29 = vsel %vm737_vm3, %v833_v59, %v840_v46  ;;  %v2958_v37 = vsel %vm737_vm3, %v965_v5, %v966_v52 }
 0x12a   :  { %v2950_v13 = vsel %vm737_vm3, %v3854_v17, %v971_v24  ;;  %v2961_v14 = vsel %vm737_vm3, %v966_v52, %v973_v51  ;;  %v1150_v35 = vmul.f32 %v2660_v33, %v2756_v10  ;;  %v1139_v45 = vmul.f32 %v2662_v34, %v2843_v18 }
 0x12b   :  { %v2967_v7 = vsel %vm1077_vm4, %v1190_v49, %v1191_v16  ;;  %v1277_v46 = vmul.f32 %v2664_v8, %v2703_v32  ;;  %v1280_v51 = vmul.f32 %v2664_v8, %v2711_v36  ;;  %v2980_v48 = vmul.f32 %v2690_v20, %v2743_v62 }
 0x12c   :  { %v1197_v52 = vrot.slane %v1150_v35, 2  ;;  %v2984_v5 = vmul.f32 %v2690_v20, %v2716_v38  ;;  %v1178_v17 = vrot.slane %v1139_v45, 2  ;;  %v1283_v32 = vmul.f32 %v2664_v8, %v2756_v10 }
 0x12d   :  { %568 = vrot.lane.b32.xlu1 %v539_v28, %s2421_s25  ;;  %1199 = vrot.lane.b32.xlu0 %v2861_v9, %s2421_s25  ;;  %v1323_v36 = vrot.slane %v1277_v46, 2  ;;  %v1324_v28 = vrot.slane %v1280_v51, 2  ;;  %v2995_v35 = vmul.f32 %v2671_v1, %v2792_v58  ;;  %v3855_v24 = vrot.slane %v2823_v12, 2 }
 0x12e   :  { %v2991_v49 = vsel %vm1077_vm4, %v1191_v16, %v1197_v52  ;;  %v1330_v45 = vrot.slane %v1283_v32, 2  ;;  %v1272_v10 = vmul.f32 %v2666_v0, %v2843_v18  ;;  %v3006_v9 = vmul.f32 %v2676_v4, %v2792_v58 }
 0x12f   :  { %v3000_v43 = vsel %vm1077_vm4, %v3855_v24, %v1178_v17  ;;  %v3009_v16 = vsel %vm1077_vm4, %v1323_v36, %v1324_v28  ;;  %v795_v46 = vmul.f32 %v2639_v54, %v2746_v63  ;;  %v798_v12 = vmul.f32 %v2639_v54, %v2719_v40 }
 0x130   :  { %v3017_v24 = vmul.f32 %v2671_v1, %v2805_v3  ;;  %v3021_v52 = vsel %vm1077_vm4, %v1324_v28, %v1330_v45  ;;  %v1311_v51 = vrot.slane %v1272_v10, 2  ;;  %v801_v17 = vmul.f32 %v2639_v54, %v2722_v41 }
 0x131   :  { %661 = vrot.lane.b32.xlu1 %v632_v15, %s2422_s26  ;;  %v3027_v32 = vmul.f32 %v2676_v4, %v2805_v3  ;;  %1332 = vrot.lane.b32.xlu0 %v2874_v27, %s2422_s26  ;;  %v835_v36 = vrot.slane %v795_v46, 1  ;;  %v836_v59 = vrot.slane %v798_v12, 1  ;;  %v928_v1 = vmul.f32 %v2652_v60, %v2746_v63 }
 0x132   :  { %v931_v15 = vmul.f32 %v2652_v60, %v2719_v40  ;;  %v3856_v28 = vrot.slane %v2829_v44, 2  ;;  %v842_v54 = vrot.slane %v801_v17, 1  ;;  %v802_v4 = vmul.f32 %v2641_v55, %v2789_v56 }
 0x133   :  { %v3044_v27 = vmul.f32 %v2641_v55, %v2799_v30  ;;  %v3047_v10 = vsel %vm737_vm3, %v835_v36, %v836_v59  ;;  %v968_v46 = vrot.slane %v928_v1, 1  ;;  %v934_v62 = vmul.f32 %v2652_v60, %v2722_v41 }
 0x134   :  { %v3038_v45 = vsel %vm1077_vm4, %v3856_v28, %v1311_v51  ;;  %v969_v12 = vrot.slane %v931_v15, 1  ;;  %v3054_v44 = vsel %vm737_vm3, %v836_v59, %v842_v54  ;;  %v844_v51 = vrot.slane %v802_v4, 1 }
 0x135   :  { %875 = vrot.lane.b32.xlu1 %v2877_v57, %s2421_s25  ;;  %v3835_v17 = vrot.slane %v3044_v27, 1  ;;  %v935_v28 = vmul.f32 %v2654_v61, %v2789_v56  ;;  %861 = vrot.lane.b32.xlu0 %v834_v42, %s2421_s25  ;;  %v975_v1 = vrot.slane %v934_v62, 1  ;;  %v3065_v60 = vmul.f32 %v2654_v61, %v2799_v30 }
 0x136   :  { %v3061_v36 = vsel %vm737_vm3, %v968_v46, %v969_v12  ;;  %v1135_v57 = vmul.f32 %v2660_v33, %v2746_v63  ;;  %v1138_v42 = vmul.f32 %v2660_v33, %v2719_v40  ;;  %v1142_v54 = vmul.f32 %v2662_v34, %v2789_v56 }
 0x137   :  { %3857 = vst [vmem:[#allocation17_spill] sm:$0xff] %v3061_v36  ;;  %v3072_v59 = vsel %vm737_vm3, %v844_v51, %v3835_v17  ;;  %v977_v15 = vrot.slane %v935_v28, 1  ;;  %v3079_v62 = vsel %vm737_vm3, %v969_v12, %v975_v1  ;;  %v3836_v4 = vrot.slane %v3065_v60, 1 }
 0x138   :  { %3858 = vst [vmem:[#allocation18_spill] sm:$0xff] %v3072_v59  ;;  %3859 = vst [vmem:[#allocation19_spill] sm:$0xff] %v3079_v62  ;;  %v1175_v46 = vrot.slane %v1135_v57, 2  ;;  %v3084_v36 = vmul.f32 %v2662_v34, %v2799_v30  ;;  %v1176_v51 = vrot.slane %v1138_v42, 2  ;;  %v1184_v28 = vrot.slane %v1142_v54, 2 }
 0x139   :  { %881 = vrot.lane.b32.xlu1 %v2898_v19, %s2421_s25  ;;  %v1141_v17 = vmul.f32 %v2660_v33, %v2722_v41  ;;  %v803_v59 = vmul.f32 %v2695_v21, %v2792_v58  ;;  %867 = vrot.lane.b32.xlu0 %v2955_v29, %s2421_s25  ;;  %v3097_v12 = vsel %vm737_vm3, %v977_v15, %v3836_v4 }
 0x13a   :  { %3860 = vst [vmem:[#allocation20_spill] sm:$0xff] %v3097_v12  ;;  %v1185_v1 = vrot.slane %v3084_v36, 2  ;;  %v806_v19 = vmul.f32 %v2695_v21, %v2805_v3  ;;  %v1268_v57 = vmul.f32 %v2664_v8, %v2746_v63  ;;  %v3105_v33 = vsel %vm1077_vm4, %v1175_v46, %v1176_v51 }
 0x13b   :  { %v1182_v42 = vrot.slane %v1141_v17, 2  ;;  %v847_v54 = vrot.slane %v803_v59, 1  ;;  %v1271_v29 = vmul.f32 %v2664_v8, %v2719_v40  ;;  %v809_v62 = vmul.f32 %v2695_v21, %v2808_v6 }
 0x13c   :  { %v3112_v15 = vsel %vm1077_vm4, %v1184_v28, %v1185_v1  ;;  %v848_v4 = vrot.slane %v806_v19, 1  ;;  %v1308_v12 = vrot.slane %v1268_v57, 2  ;;  %v1274_v40 = vmul.f32 %v2664_v8, %v2722_v41 }
 0x13d   :  { %865 = vrot.lane.b32.xlu1 %v2909_v47, %s2421_s25  ;;  %v3119_v63 = vsel %vm1077_vm4, %v1176_v51, %v1182_v42  ;;  %v1309_v17 = vrot.slane %v1271_v29, 2  ;;  %v936_v59 = vmul.f32 %v2681_v11, %v2792_v58  ;;  %994 = vrot.lane.b32.xlu0 %v2958_v37, %s2422_s26  ;;  %v3861_v46 = vrot.slane %v2939_v26, 2 }
 0x13e   :  { %v3862_v21 = vrot.slane %v2930_v23, 2  ;;  %v3133_v47 = vsel %vm737_vm3, %v847_v54, %v848_v4  ;;  %v855_v51 = vrot.slane %v809_v62, 1  ;;  %v939_v19 = vmul.f32 %v2681_v11, %v2805_v3 }
 0x13f   :  { %v3138_v8 = vsel %vm1077_vm4, %v1308_v12, %v1309_v17  ;;  %v1315_v41 = vrot.slane %v1274_v40, 2  ;;  %v980_v57 = vrot.slane %v936_v59, 1  ;;  %v942_v37 = vmul.f32 %v2681_v11, %v2808_v6 }
 0x140   :  { %v1174_v28 = vsel %vm1077_vm4, %v3862_v21, %v3861_v46  ;;  %v3863_v42 = vrot.slane %v2943_v22, 2  ;;  %v3864_v23 = vmov %v3861_v46  ;;  %v1305_v54 = vrot.slane %v2980_v48, 2 }
 0x141   :  { %v3149_v62 = vsel %vm737_vm3, %v848_v4, %v855_v51  ;;  %v981_v46 = vrot.slane %v939_v19, 1  ;;  %1008 = vrot.lane.b32.xlu1 %v2921_v50, %s2422_s26  ;;  %v1306_v12 = vrot.slane %v2984_v5, 2  ;;  %v3155_v40 = vsel %vm1077_vm4, %v1309_v17, %v1315_v41  ;;  %1000 = vrot.lane.b32.xlu0 %v2961_v14, %s2422_s26 }
 0x142   :  { %v1181_v29 = vsel %vm1077_vm4, %v3864_v23, %v3863_v42  ;;  %v988_v11 = vrot.slane %v942_v37, 1  ;;  %v1143_v26 = vmul.f32 %v2740_v39, %v2792_v58  ;;  %v1146_v48 = vmul.f32 %v2740_v39, %v2805_v3 }
 0x143   :  { %v3162_v22 = vsel %vm737_vm3, %v980_v57, %v981_v46  ;;  %v808_v50 = vmul.f32 %v2641_v55, %v2802_v53  ;;  %v1149_v4 = vmul.f32 %v2740_v39, %v2808_v6  ;;  %v941_v21 = vmul.f32 %v2654_v61, %v2802_v53 }
 0x144   :  { %v3171_v17 = vsel %vm737_vm3, %v981_v46, %v988_v11  ;;  %v1187_v59 = vrot.slane %v1143_v26, 2  ;;  %v1276_v14 = vmul.f32 %v2690_v20, %v2792_v58  ;;  %v1188_v51 = vrot.slane %v1146_v48, 2 }
 0x145   :  { %v853_v19 = vrot.slane %v808_v50, 1  ;;  %v1195_v41 = vrot.slane %v1149_v4, 2  ;;  %v1279_v57 = vmul.f32 %v2690_v20, %v2805_v3  ;;  %1014 = vrot.lane.b32.xlu1 %v2935_v2, %s2422_s26  ;;  %v1273_v55 = vmul.f32 %v2690_v20, %v2855_v25  ;;  %1201 = vrot.lane.b32.xlu0 %v1174_v28, %s2421_s25 }
 0x146   :  { %v986_v39 = vrot.slane %v941_v21, 1  ;;  %v1320_v37 = vrot.slane %v1276_v14, 2  ;;  %v1148_v61 = vmul.f32 %v2662_v34, %v2802_v53  ;;  %v3187_v42 = vsel %vm1077_vm4, %v1187_v59, %v1188_v51 }
 0x147   :  { %v3865_v23 = vrot.slane %v3044_v27, 1  ;;  %v3195_v2 = vsel %vm1077_vm4, %v1188_v51, %v1195_v41  ;;  %v1321_v11 = vrot.slane %v1279_v57, 2  ;;  %v3866_v26 = vrot.slane %v3065_v60, 1  ;;  %v3868_v57 = vld [vmem:[#allocation10_spill] sm:$0xff] }
 0x148   :  { %v1193_v34 = vrot.slane %v1148_v61, 2  ;;  %v1282_v28 = vmul.f32 %v2690_v20, %v2808_v6  ;;  %v1278_v50 = vmul.f32 %v2666_v0, %v2799_v30  ;;  %v1307_v27 = vsel %vm1077_vm4, %v1305_v54, %v1306_v12  ;;  %v3867_v54 = vld [vmem:[#allocation13_spill] sm:$0xff] }
 0x149   :  { %v3192_v46 = vsel %vm737_vm3, %v3865_v23, %v853_v19  ;;  %v3200_v48 = vsel %vm737_vm3, %v3866_v26, %v986_v39  ;;  %v3210_v4 = vsel %vm1077_vm4, %v1320_v37, %v1321_v11  ;;  %v1281_v60 = vmul.f32 %v2666_v0, %v2802_v53  ;;  %998 = vrot.lane.b32.xlu1 %v2950_v13, %s2422_s26  ;;  %v3869_v39 = vld [vmem:[#allocation16_spill] sm:$0xff] }
 0x14a   :  { %v1275_v59 = vmul.f32 %v2666_v0, %v2789_v56  ;;  %v3221_v20 = vsel %vm1077_vm4, %v1185_v1, %v1193_v34  ;;  %v1328_v21 = vrot.slane %v1282_v28, 2  ;;  %v1318_v14 = vrot.slane %v1278_v50, 2  ;;  %1207 = vrot.lane.b32.xlu0 %v1181_v29, %s2421_s25 }
 0x14b   :  { %v713_v51 = vmul.f32 %v3867_v54, %v2700_v31  ;;  %v1326_v19 = vrot.slane %v1281_v60, 2  ;;  %v715_v0 = vmul.f32 %v3867_v54, %v3868_v57  ;;  %v717_v13 = vmul.f32 %v3867_v54, %v2843_v18 }
 0x14c   :  { %v1317_v41 = vrot.slane %v1275_v59, 2  ;;  %v3231_v36 = vsel %vm1077_vm4, %v1321_v11, %v1328_v21  ;;  %v1053_v37 = vmul.f32 %v3869_v39, %v2700_v31  ;;  %v1055_v61 = vmul.f32 %v3869_v39, %v3868_v57 }
 0x14d   :  { %v738_v1 = vrot.slane %v713_v51, 1  ;;  %v3238_v29 = vsel %vm1077_vm4, %v1318_v14, %v1326_v19  ;;  %v739_v26 = vrot.slane %v715_v0, 1  ;;  %v744_v34 = vrot.slane %v717_v13, 1  ;;  %1215 = vrot.lane.b32.xlu1 %v2967_v7, %s2421_s25  ;;  %v3871_v51 = vld [vmem:[#allocation15_spill] sm:$0xff] }
 0x14e   :  { %v3241_v23 = vsel %vm1077_vm4, %v1317_v41, %v1318_v14  ;;  %v1313_v11 = vrot.slane %v1273_v55, 2  ;;  %v1078_v28 = vrot.slane %v1053_v37, 2  ;;  %v1079_v50 = vrot.slane %v1055_v61, 2  ;;  %1334 = vrot.lane.b32.xlu0 %v1307_v27, %s2422_s26  ;;  %v3870_v14 = vld [vmem:[#allocation7_spill] sm:$0xff] }
 0x14f   :  { %v1057_v60 = vmul.f32 %v3869_v39, %v2843_v18  ;;  %v3249_v59 = vsel %vm737_vm3, %v738_v1, %v739_v26  ;;  %v3252_v21 = vsel %vm737_vm3, %v739_v26, %v744_v34  ;;  %v3256_v19 = vrot.slane %v3871_v51, %v3870_v14  ;;  %v3873_v0 = vld [vmem:[#allocation11_spill] sm:$0xff]  ;;  %v3874_v26 = vld [vmem:[#allocation9_spill] sm:$0xff] }
 0x150   :  { %v3259_v7 = vsel %vm1077_vm4, %v1078_v28, %v1079_v50  ;;  %v1314_v18 = vsel %vm1077_vm4, %v1306_v12, %v1313_v11  ;;  %v3275_v13 = vrot.slane %v3873_v0, %v3870_v14  ;;  %v721_v61 = vmul.f32 %v3867_v54, %v2799_v30 }
 0x151   :  { %v1084_v55 = vrot.slane %v1057_v60, 2  ;;  %v3263_v41 = vmul.f32 %v3256_v19, %v2716_v38  ;;  %1221 = vrot.lane.b32.xlu1 %v2991_v49, %s2421_s25  ;;  %v1058_v1 = vmul.f32 %v3256_v19, %v2855_v25  ;;  %v719_v49 = vmul.f32 %v3867_v54, %v2789_v56 }
 0x152   :  { %1340 = vrot.lane.b32.xlu0 %v1314_v18, %s2422_s26  ;;  %v720_v12 = vmul.f32 %v3275_v13, %v2792_v58  ;;  %v540_v34 = vmul.f32 %v3874_v26, %v2789_v56  ;;  %v722_v11 = vmul.f32 %v3275_v13, %v2805_v3  ;;  %v749_v60 = vrot.slane %v721_v61, 1  ;;  %v3876_v18 = vld [vmem:[#allocation8_spill] sm:$0xff] }
 0x153   :  { %3872 = vst [vmem:[#allocation13_spill] sm:$0xff] %v3263_v41  ;;  %v3271_v27 = vsel %vm1077_vm4, %v1079_v50, %v1084_v55  ;;  %v3837_v37 = vrot.slane %v3263_v41, 2  ;;  %v1086_v5 = vrot.slane %v1058_v1, 2  ;;  %v748_v28 = vrot.slane %v719_v49, 1 }
 0x154   :  { %v751_v51 = vrot.slane %v720_v12, 1  ;;  %v724_v55 = vmul.f32 %v3275_v13, %v2808_v6  ;;  %v633_v0 = vmul.f32 %v3876_v18, %v2789_v56  ;;  %v752_v1 = vrot.slane %v722_v11, 1 }
 0x155   :  { %1205 = vrot.lane.b32.xlu1 %v3000_v43, %s2421_s25  ;;  %v3296_v50 = vsel %vm1077_vm4, %v3837_v37, %v1086_v5  ;;  %v1059_v49 = vmul.f32 %v3869_v39, %v2789_v56  ;;  %v1060_v43 = vmul.f32 %v3256_v19, %v2792_v58  ;;  %v3308_v5 = vsel %vm737_vm3, %v748_v28, %v749_v60 }
 0x156   :  { %3875 = vst [vmem:[#allocation10_spill] sm:$0xff] %v3296_v50  ;;  %570 = vrot.lane.b32.xlu0 %v540_v34, %s2421_s25  ;;  %3877 = vst [vmem:[#allocation16_spill] sm:$0xff] %v3308_v5  ;;  %v756_v61 = vrot.slane %v724_v55, 1  ;;  %v1061_v12 = vmul.f32 %v3869_v39, %v2799_v30  ;;  %v1062_v34 = vmul.f32 %v3256_v19, %v2805_v3 }
 0x157   :  { %v3315_v37 = vsel %vm737_vm3, %v751_v51, %v752_v1  ;;  %v1088_v11 = vrot.slane %v1059_v49, 2  ;;  %v1091_v50 = vrot.slane %v1060_v43, 2  ;;  %v723_v41 = vmul.f32 %v3867_v54, %v2802_v53 }
 0x158   :  { %v3322_v28 = vsel %vm737_vm3, %v752_v1, %v756_v61  ;;  %v1089_v55 = vrot.slane %v1061_v12, 2  ;;  %v1092_v5 = vrot.slane %v1062_v34, 2  ;;  %v1064_v58 = vmul.f32 %v3256_v19, %v2808_v6 }
 0x159   :  { %1348 = vrot.lane.b32.xlu1 %v3009_v16, %s2422_s26  ;;  %v754_v51 = vrot.slane %v723_v41, 1  ;;  %v1063_v49 = vmul.f32 %v3869_v39, %v2802_v53 }
 0x15a   :  { %663 = vrot.lane.b32.xlu0 %v633_v0, %s2422_s26  ;;  %v3330_v43 = vsel %vm1077_vm4, %v1088_v11, %v1089_v55  ;;  %v3333_v54 = vsel %vm1077_vm4, %v1091_v50, %v1092_v5  ;;  %v1096_v16 = vrot.slane %v1064_v58, 2  ;;  %v3878_v58 = vld [vmem:[#allocation17_spill] sm:$0xff]  ;;  %v3883_v50 = vld [vmem:[#allocation12_spill] sm:$0xff] }
 0x15b   :  { %v3336_v1 = vsel %vm737_vm3, %v749_v60, %v754_v51  ;;  %v1094_v61 = vrot.slane %v1063_v49, 2 }
 0x15c   :  { %v3341_v6 = vsel %vm1077_vm4, %v1092_v5, %v1096_v16 }
 0x15d   :  { %1354 = vrot.lane.b32.xlu1 %v3021_v52, %s2422_s26  ;;  %v3346_v53 = vsel %vm1077_vm4, %v1089_v55, %v1094_v61  ;;  %v3881_v52 = vld [vmem:[#allocation20_spill] sm:$0xff] }
 0x15e   :  { %572 = vrot.lane.b32.xlu0 %v2995_v35, %s2421_s25  ;;  %v3879_v35 = vld [vmem:[#allocation18_spill] sm:$0xff] }
 0x161   :  { %1338 = vrot.lane.b32.xlu1 %v3038_v45, %s2422_s26  ;;  %v486_v45 = vld [vmem:[%s3802_s3] ss:$8 sm:$0x3] }
 0x162   :  { %665 = vrot.lane.b32.xlu0 %v3006_v9, %s2422_s26  ;;  %v3880_v9 = vld [vmem:[#allocation19_spill] sm:$0xff] }
 0x165   :  { %863 = vrot.lane.b32.xlu1 %v3047_v10, %s2421_s25 }
 0x166   :  { %578 = vrot.lane.b32.xlu0 %v3017_v24, %s2421_s25 }
 0x169   :  { %869 = vrot.lane.b32.xlu1 %v3054_v44, %s2421_s25 }
 0x16a   :  { %671 = vrot.lane.b32.xlu0 %v3027_v32, %s2422_s26 }
 0x16d   :  { %996 = vrot.lane.b32.xlu1 %v3878_v58, %s2422_s26 }
 0x16e   :  { %871 = vrot.lane.b32.xlu0 %v3879_v35, %s2421_s25 }
 0x171   :  { %1002 = vrot.lane.b32.xlu1 %v3880_v9, %s2422_s26 }
 0x172   :  { %1004 = vrot.lane.b32.xlu0 %v3881_v52, %s2422_s26 }
 0x175   :  { %1203 = vrot.lane.b32.xlu1 %v3105_v33, %s2421_s25  ;;  %v543_v33 = vmul.f32 %v3874_v26, %v2799_v30 }
 0x176   :  { %1211 = vrot.lane.b32.xlu0 %v3112_v15, %s2421_s25  ;;  %v3882_v15 = vld [vmem:[#allocation6_spill] sm:$0xff] }
 0x179   :  { %1209 = vrot.lane.b32.xlu1 %v3119_v63, %s2421_s25  ;;  %v3394_v63 = vrot.slane %v486_v45, %v3882_v15 }
 0x17a   :  { %873 = vrot.lane.b32.xlu0 %v3133_v47, %s2421_s25  ;;  %v3400_v47 = vrot.slane %v486_v45, %v3870_v14 }
 0x17d   :  { %1336 = vrot.lane.b32.xlu1 %v3138_v8, %s2422_s26 }
 0x17e   :  { %879 = vrot.lane.b32.xlu0 %v3149_v62, %s2421_s25  ;;  %v3380_v24 = vpop.permute.xlu1 %574  ;;  %v559_v32 = vpop.permute.xlu0 %558 }
 0x181   :  { %1342 = vrot.lane.b32.xlu1 %v3155_v40, %s2422_s26  ;;  %v498_v40 = vmul.f32 %v3394_v63, %v2700_v31 }
 0x182   :  { %1006 = vrot.lane.b32.xlu0 %v3162_v22, %s2422_s26  ;;  %v3389_v10 = vpop.permute.xlu1 %667  ;;  %v652_v44 = vpop.permute.xlu0 %651  ;;  %v636_v22 = vmul.f32 %v3876_v18, %v2799_v30 }
 0x185   :  { %576 = vrot.lane.b32.xlu1 %v543_v33, %s2421_s25 }
 0x186   :  { %1012 = vrot.lane.b32.xlu0 %v3171_v17, %s2422_s26  ;;  %v563_v8 = vpop.permute.xlu1 %562  ;;  %v561_v62 = vpop.permute.xlu0 %560  ;;  %v499_v17 = vmul.f32 %v3400_v47, %v3883_v50 }
 0x187   :  { %v583_v39 = vsel %vm582_vm5, %v559_v32, %v561_v62  ;;  %v584_v41 = vsel %vm582_vm5, %v561_v62, %v563_v8 }
 0x188   :  { %v599_v26 = vadd.f32 %v583_v39, %v498_v40  ;;  %v600_v0 = vadd.f32 %v584_v41, %v499_v17 }
 0x189   :  { %669 = vrot.lane.b32.xlu1 %v636_v22, %s2422_s26  ;;  %v2356_v22 = vld [vmem:[%s3804_s5 + $0x48] sm:$0xff]  }
 0x18a   :  { %1213 = vrot.lane.b32.xlu0 %v3187_v42, %s2421_s25 }
 0x18b   :  { %v656_v60 = vpop.permute.xlu1 %655  ;;  %v654_v31 = vpop.permute.xlu0 %653 }
 0x18c   :  { %v676_v5 = vsel %vm675_vm6, %v652_v44, %v654_v31  ;;  %v677_v18 = vsel %vm675_vm6, %v654_v31, %v656_v60  ;;  %v2357_v60 = vld [vmem:[%s3804_s5 + $0x8] sm:$0xff]   ;;  %v2358_v31 = vld [vmem:[%s3804_s5 + $0x50] sm:$0xff]  }
 0x18d   :  { %877 = vrot.lane.b32.xlu1 %v3192_v46, %s2421_s25  ;;  %v692_v12 = vadd.f32 %v676_v5, %v599_v26  ;;  %v3417_v34 = vadd.f32 %v677_v18, %v600_v0  ;;  %v500_v46 = vmul.f32 %v3394_v63, %v3868_v57 }
 0x18e   :  { %1219 = vrot.lane.b32.xlu0 %v3195_v2, %s2421_s25 }
 0x18f   :  { %v3421_v11 = vpop.permute.xlu1 %580  ;;  %v567_v42 = vpop.permute.xlu0 %566  ;;  %v766_v55 = vadd.f32 %v3249_v59, %v692_v12  ;;  %v2359_v12 = vld [vmem:[%s3804_s5 + $0x10] sm:$0xff]  }
 0x191   :  { %1010 = vrot.lane.b32.xlu1 %v3200_v48, %s2422_s26 }
 0x192   :  { %1346 = vrot.lane.b32.xlu0 %v3210_v4, %s2422_s26 }
 0x193   :  { %v565_v51 = vpop.permute.xlu1 %564  ;;  %v660_v16 = vpop.permute.xlu0 %659 }
 0x194   :  { %v585_v49 = vsel %vm582_vm5, %v565_v51, %v567_v42 }
 0x195   :  { %v601_v61 = vadd.f32 %v585_v49, %v500_v46  ;;  %1217 = vrot.lane.b32.xlu1 %v3221_v20, %s2421_s25  ;;  %v3444_v20 = vmul.f32 %v3275_v13, %v2716_v38 }
 0x196   :  { %1352 = vrot.lane.b32.xlu0 %v3231_v36, %s2422_s26  ;;  %v718_v36 = vmul.f32 %v3275_v13, %v2855_v25 }
 0x197   :  { %v3435_v2 = vpop.permute.xlu1 %673  ;;  %v860_v48 = vpop.permute.xlu0 %859  ;;  %v742_v32 = vrot.slane %v3444_v20, 1  ;;  %v505_v20 = vmul.f32 %v3400_v47, %v2805_v3 }
 0x198   :  { %v746_v45 = vrot.slane %v718_v36, 1 }
 0x199   :  { %1350 = vrot.lane.b32.xlu1 %v3238_v29, %s2422_s26 }
 0x19a   :  { %1344 = vrot.lane.b32.xlu0 %v3241_v23, %s2422_s26  ;;  %v501_v23 = vmul.f32 %v3400_v47, %v2716_v38  ;;  %v747_v25 = vsel %vm737_vm3, %v742_v32, %v746_v45  ;;  %v2355_v38 = vld [vmem:[%s3804_s5] sm:$0xff]  }
 0x19b   :  { %v658_v4 = vpop.permute.xlu1 %657  ;;  %v993_v59 = vpop.permute.xlu0 %992 }
 0x19c   :  { %v678_v57 = vsel %vm675_vm6, %v658_v4, %v660_v16  ;;  %v2362_v4 = vld [vmem:[%s3804_s5 + $0x60] sm:$0xff]  }
 0x19d   :  { %v694_v58 = vadd.f32 %v678_v57, %v601_v61  ;;  %v2361_v61 = vld [vmem:[%s3804_s5 + $0x18] sm:$0xff]  }
 0x19f   :  { %v569_v35 = vpop.permute.xlu1 %568  ;;  %v768_v9 = vadd.f32 %v3252_v21, %v694_v58  ;;  %v1200_v52 = vpop.permute.xlu0 %1199  ;;  %v2354_v21 = vld [vmem:[%s3804_s5 + $0x40] sm:$0xff]  }
 0x1a0   :  { %v586_v29 = vsel %vm582_vm5, %v567_v42, %v569_v35  ;;  %2223 = vmatprep.subr.bf16.mxu0 %v2354_v21  ;;  %v2360_v42 = vld [vmem:[%s3804_s5 + $0x58] sm:$0xff]   ;;  %v2364_v35 = vld [vmem:[%s3804_s5 + $0x68] sm:$0xff]  }
 0x1a1   :  { %v602_v44 = vadd.f32 %v586_v29, %v501_v23  ;;  %2224 = vmatpush3.bf16.msra.mxu0 %v2355_v38  ;;  %v2368_v21 = vld [vmem:[%s3804_s5 + $0x78] sm:$0xff]  }
 0x1a2   :  { %2225 = vmatprep.subr.bf16.mxu0 %v2356_v22 }
 0x1a3   :  { %v662_v33 = vpop.permute.xlu1 %661  ;;  %v1333_v62 = vpop.permute.xlu0 %1332 }
 0x1a4   :  { %v679_v8 = vsel %vm675_vm6, %v660_v16, %v662_v33 }
 0x1a5   :  { %v695_v40 = vadd.f32 %v679_v8, %v602_v44  ;;  %2226 = vmatpush3.bf16.msra.mxu0 %v2357_v60  ;;  %v2366_v44 = vld [vmem:[%s3804_s5 + $0x70] sm:$0xff]  }
 0x1a6   :  { %2227 = vmatprep.subr.bf16.mxu0 %v2358_v31 }
 0x1a7   :  { %v3466_v39 = vpop.permute.xlu1 %875  ;;  %v3468_v41 = vadd.f32 %v747_v25, %v695_v40  ;;  %v3470_v26 = vpop.permute.xlu0 %861 }
 0x1a8   :  { %v883_v17 = vsel %vm582_vm5, %v860_v48, %v3470_v26 }
 0x1a9   :  { %v899_v0 = vadd.f32 %v883_v17, %v766_v55  ;;  %2228 = vmatpush3.bf16.msra.mxu0 %v2359_v12 }
 0x1aa   :  { %2229 = vmatprep.subr.bf16.mxu0 %v2360_v42 }
 0x1ab   :  { %v3480_v5 = vpop.permute.xlu1 %881  ;;  %v3482_v18 = vpop.permute.xlu0 %867 }
 0x1ad   :  { %2230 = vmatpush3.bf16.msra.mxu0 %v2361_v61 }
 0x1ae   :  { %2231 = vmatprep.subr.bf16.mxu0 %v2362_v4 }
 0x1af   :  { %v866_v55 = vpop.permute.xlu1 %865  ;;  %v3492_v46 = vpop.permute.xlu0 %994 }
 0x1b0   :  { %v885_v51 = vsel %vm582_vm5, %v866_v55, %v3482_v18  ;;  %v1016_v16 = vsel %vm675_vm6, %v993_v59, %v3492_v46  ;;  %v2363_v59 = vld [vmem:[%s3804_s5 + $0x20] sm:$0xff]   ;;  %v2423_v55 = vmov 0.0  }
 0x1b1   :  { %v901_v49 = vadd.f32 %v885_v51, %v768_v9  ;;  %v1032_v48 = vadd.f32 %v1016_v16, %v899_v0  ;;  %2232 = vmatpush3.bf16.msra.mxu0 %v2363_v59  ;;  %v2369_v0 = vld [vmem:[%s3804_s5 + $0x38] sm:$0xff]  }
 0x1b2   :  { %2233 = vmatprep.subr.bf16.mxu0 %v2364_v35 }
 0x1b3   :  { %v3502_v57 = vpop.permute.xlu1 %1008  ;;  %v3504_v58 = vpop.permute.xlu0 %1000  ;;  %v1106_v36 = vadd.f32 %v3259_v7, %v1032_v48  ;;  %v2365_v7 = vld [vmem:[%s3804_s5 + $0x28] sm:$0xff]  }
 0x1b5   :  { %2234 = vmatpush3.bf16.msra.mxu0 %v2365_v7  ;;  %v3884_v7 = vld [vmem:[#allocation14_spill] sm:$0xff] }
 0x1b6   :  { %2235 = vmatprep.subr.bf16.mxu0 %v2366_v44 }
 0x1b7   :  { %v3513_v9 = vpop.permute.xlu1 %1014  ;;  %v3515_v29 = vpop.permute.xlu0 %1201 }
 0x1b8   :  { %v1223_v23 = vsel %vm582_vm5, %v1200_v52, %v3515_v29  ;;  %v2367_v52 = vld [vmem:[%s3804_s5 + $0x30] sm:$0xff]  }
 0x1b9   :  { %v1239_v45 = vadd.f32 %v1223_v23, %v1106_v36  ;;  %2236 = vmatpush3.bf16.msra.mxu0 %v2367_v52  ;;  %v714_v36 = vmul.f32 %v3275_v13, %v3883_v50  ;;  %v502_v23 = vmul.f32 %v3394_v63, %v2789_v56 }
 0x1ba   :  { %2237 = vmatprep.subr.bf16.mxu0 %v2368_v21 }
 0x1bb   :  { %v999_v33 = vpop.permute.xlu1 %998  ;;  %v741_v21 = vrot.slane %v714_v36, 1 }
 0x1bc   :  { %v1018_v8 = vsel %vm675_vm6, %v999_v33, %v3504_v58  ;;  %v3527_v40 = vpop.permute.xlu0 %1207 }
 0x1bd   :  { %v1034_v25 = vadd.f32 %v1018_v8, %v901_v49  ;;  %2238 = vmatpush3.bf16.msra.mxu0 %v2369_v0  ;;  %v743_v56 = vsel %vm737_vm3, %v741_v21, %v742_v32 }
 0x1be   :  { %2297 = vmatprep.subr.bf16.mxu0 %v2423_v55 }
 0x1bf   :  { %v3535_v38 = vpop.permute.xlu1 %1215  ;;  %v1108_v22 = vadd.f32 %v3271_v27, %v1034_v25 }
 0x1c0   :  { %v3538_v17 = vpop.permute.xlu0 %1334 }
 0x1c1   :  { %v1356_v60 = vsel %vm675_vm6, %v1333_v62, %v3538_v17 }
 0x1c2   :  { %v3545_v31 = vadd.f32 %v1356_v60, %v1239_v45  ;;  %v503_v45 = vmul.f32 %v3400_v47, %v3884_v7 }
 0x1c3   :  { %v3547_v12 = vpop.permute.xlu1 %1221 }
 0x1c4   :  { %v3549_v42 = vpop.permute.xlu0 %1340 }
 0x1c7   :  { %v1206_v27 = vpop.permute.xlu1 %1205 }
 0x1c8   :  { %v1225_v62 = vsel %vm582_vm5, %v1206_v27, %v3527_v40  ;;  %v571_v51 = vpop.permute.xlu0 %570 }
 0x1c9   :  { %v1241_v49 = vadd.f32 %v1225_v62, %v1108_v22  ;;  %v767_v62 = vadd.f32 %v743_v56, %v3417_v34 }
 0x1cb   :  { %v3554_v16 = vpop.permute.xlu1 %1348 }
 0x1cc   :  { %v664_v61 = vpop.permute.xlu0 %663 }
 0x1cf   :  { %v3556_v48 = vpop.permute.xlu1 %1354 }
 0x1d0   :  { %v573_v4 = vpop.permute.xlu0 %572 }
 0x1d1   :  { %v587_v59 = vsel %vm582_vm5, %v571_v51, %v573_v4  ;;  %v588_v35 = vsel %vm582_vm5, %v573_v4, %v3380_v24 }
 0x1d2   :  { %v603_v33 = vadd.f32 %v587_v59, %v502_v23  ;;  %v604_v8 = vadd.f32 %v588_v35, %v503_v45  ;;  %v1054_v23 = vmul.f32 %v3256_v19, %v3883_v50 }
 0x1d3   :  { %v1339_v44 = vpop.permute.xlu1 %1338 }
 0x1d4   :  { %v1358_v25 = vsel %vm675_vm6, %v1339_v44, %v3549_v42  ;;  %v666_v52 = vpop.permute.xlu0 %665  ;;  %v1081_v44 = vrot.slane %v1054_v23, 2 }
 0x1d5   :  { %v1374_v13 = vadd.f32 %v1358_v25, %v1241_v49  ;;  %v680_v22 = vsel %vm675_vm6, %v664_v61, %v666_v52  ;;  %v681_v24 = vsel %vm675_vm6, %v666_v52, %v3389_v10  ;;  %v3885_v49 = vld [vmem:[#allocation16_spill] sm:$0xff] }
 0x1d6   :  { %v696_v60 = vadd.f32 %v680_v22, %v603_v33  ;;  %v697_v0 = vadd.f32 %v681_v24, %v604_v8  ;;  %v3886_v8 = vld [vmem:[#allocation13_spill] sm:$0xff]  ;;  %v3888_v24 = vld [vmem:[#allocation10_spill] sm:$0xff] }
 0x1d7   :  { %v864_v27 = vpop.permute.xlu1 %863  ;;  %v3887_v25 = vrot.slane %v3886_v8, 2 }
 0x1d8   :  { %v884_v51 = vsel %vm582_vm5, %v3470_v26, %v864_v27  ;;  %v3578_v4 = vpop.permute.xlu0 %578  ;;  %v770_v36 = vadd.f32 %v3885_v49, %v696_v60  ;;  %v771_v61 = vadd.f32 %v3315_v37, %v697_v0 }
 0x1d9   :  { %v900_v59 = vadd.f32 %v884_v51, %v767_v62  ;;  %v590_v10 = vsel %vm582_vm5, %v3578_v4, %v3421_v11  ;;  %v1083_v19 = vsel %vm1077_vm4, %v1081_v44, %v3887_v25 }
 0x1da   :  { %v606_v35 = vadd.f32 %v590_v10, %v505_v20 }
 0x1db   :  { %v870_v32 = vpop.permute.xlu1 %869 }
 0x1dc   :  { %v886_v34 = vsel %vm582_vm5, %v3482_v18, %v870_v32  ;;  %v3589_v26 = vpop.permute.xlu0 %671 }
 0x1dd   :  { %v902_v37 = vadd.f32 %v886_v34, %v3468_v41  ;;  %v683_v7 = vsel %vm675_vm6, %v3589_v26, %v3435_v2 }
 0x1de   :  { %v699_v11 = vadd.f32 %v683_v7, %v606_v35 }
 0x1df   :  { %v997_v45 = vpop.permute.xlu1 %996 }
 0x1e0   :  { %v1017_v3 = vsel %vm675_vm6, %v3492_v46, %v997_v45  ;;  %v872_v47 = vpop.permute.xlu0 %871  ;;  %v773_v18 = vadd.f32 %v3322_v28, %v699_v11 }
 0x1e1   :  { %v1033_v33 = vadd.f32 %v1017_v3, %v900_v59 }
 0x1e3   :  { %v1003_v50 = vpop.permute.xlu1 %1002  ;;  %v1107_v41 = vadd.f32 %v1083_v19, %v1033_v33 }
 0x1e4   :  { %v1019_v52 = vsel %vm675_vm6, %v3504_v58, %v1003_v50  ;;  %v1005_v2 = vpop.permute.xlu0 %1004  ;;  %v1380_v58 = vld [vmem:[%s3803_s4] sm:$0x3] }
 0x1e5   :  { %v1035_v21 = vadd.f32 %v1019_v52, %v902_v37  ;;  %v3616_v49 = vrot.slane %v1380_v58, %v3870_v14  ;;  %v3619_v10 = vrot.slane %v1380_v58, %v3882_v15 }
 0x1e7   :  { %v1204_v22 = vpop.permute.xlu1 %1203  ;;  %v1109_v60 = vadd.f32 %v3888_v24, %v1035_v21  ;;  %v1394_v34 = vadd.f32 %v3619_v10, %v1374_v13  ;;  %v1392_v7 = vadd.f32 %v3619_v10, %v3545_v31 }
 0x1e8   :  { %v1224_v46 = vsel %vm582_vm5, %v3515_v29, %v1204_v22  ;;  %v3608_v0 = vpop.permute.xlu0 %1211 }
 0x1e9   :  { %v1240_v28 = vadd.f32 %v1224_v46, %v1107_v41  ;;  %v1402_v19 = vadd.f32 3.0, %v1394_v34  ;;  %v1400_v52 = vadd.f32 3.0, %v1392_v7 }
 0x1eb   :  { %v1210_v56 = vpop.permute.xlu1 %1209 }
 0x1ec   :  { %v1226_v27 = vsel %vm582_vm5, %v3527_v40, %v1210_v56  ;;  %v874_v62 = vpop.permute.xlu0 %873  ;;  %v1408_v56 = vmax.f32 %v1400_v52, 0.0 }
 0x1ed   :  { %v1242_v51 = vadd.f32 %v1226_v27, %v1109_v60  ;;  %v887_v32 = vsel %vm582_vm5, %v872_v47, %v874_v62  ;;  %v888_v40 = vsel %vm582_vm5, %v874_v62, %v3466_v39  ;;  %v1410_v60 = vmax.f32 %v1402_v19, 0.0 }
 0x1ee   :  { %v903_v11 = vadd.f32 %v887_v32, %v770_v36  ;;  %v904_v45 = vadd.f32 %v888_v40, %v771_v61 }
 0x1ef   :  { %v1337_v59 = vpop.permute.xlu1 %1336 }
 0x1f0   :  { %v1357_v29 = vsel %vm675_vm6, %v3538_v17, %v1337_v59  ;;  %v880_v20 = vpop.permute.xlu0 %879 }
 0x1f1   :  { %v1373_v35 = vadd.f32 %v1357_v29, %v1240_v28  ;;  %v890_v47 = vsel %vm582_vm5, %v880_v20, %v3480_v5 }
 0x1f2   :  { %v906_v61 = vadd.f32 %v890_v47, %v773_v18 }
 0x1f3   :  { %v1393_v23 = vadd.f32 %v3616_v49, %v1373_v35  ;;  %v1343_v37 = vpop.permute.xlu1 %1342 }
 0x1f4   :  { %v1359_v17 = vsel %vm675_vm6, %v3549_v42, %v1343_v37  ;;  %v1007_v3 = vpop.permute.xlu0 %1006 }
 0x1f5   :  { %v1375_v44 = vadd.f32 %v1359_v17, %v1242_v51  ;;  %v1020_v39 = vsel %vm675_vm6, %v1005_v2, %v1007_v3  ;;  %v1021_v13 = vsel %vm675_vm6, %v1007_v3, %v3502_v57  ;;  %v1401_v33 = vadd.f32 3.0, %v1393_v23 }
 0x1f6   :  { %v1036_v8 = vadd.f32 %v1020_v39, %v903_v11  ;;  %v1037_v25 = vadd.f32 %v1021_v13, %v904_v45  ;;  %v504_v57 = vmul.f32 %v3394_v63, %v2799_v30  ;;  %v1418_v63 = vmin.f32 %v1410_v60, 6.0 }
 0x1f7   :  { %v1395_v31 = vadd.f32 %v3616_v49, %v1375_v44  ;;  %v577_v36 = vpop.permute.xlu1 %576  ;;  %v1409_v22 = vmax.f32 %v1401_v33, 0.0 }
 0x1f8   :  { %v589_v42 = vsel %vm582_vm5, %v577_v36, %v3578_v4  ;;  %v1013_v50 = vpop.permute.xlu0 %1012  ;;  %v1110_v5 = vadd.f32 %v3330_v43, %v1036_v8  ;;  %v1111_v41 = vadd.f32 %v3333_v54, %v1037_v25  ;;  %v1426_v11 = vmul.f32 %v1418_v63, %v1394_v34 }
 0x1f9   :  { %v1403_v2 = vadd.f32 3.0, %v1395_v31  ;;  %v1023_v21 = vsel %vm675_vm6, %v1013_v50, %v3513_v9  ;;  %v605_v46 = vadd.f32 %v589_v42, %v504_v57  ;;  %v1417_v58 = vmin.f32 %v1409_v22, 6.0 }
 0x1fa   :  { %v1039_v24 = vadd.f32 %v1023_v21, %v906_v61  ;;  %v3662_v33 = vmul.f32 0.16666667, %v1426_v11 }
 0x1fb   :  { %v1411_v18 = vmax.f32 %v1403_v2, 0.0  ;;  %v670_v28 = vpop.permute.xlu1 %669  ;;  %v1425_v35 = vmul.f32 %v1417_v58, %v1393_v23 }
 0x1fc   :  { %v682_v4 = vsel %vm675_vm6, %v670_v28, %v3589_v26  ;;  %v1214_v43 = vpop.permute.xlu0 %1213  ;;  %v1113_v54 = vadd.f32 %v3341_v6, %v1039_v24  ;;  %v1416_v26 = vmin.f32 %v1408_v56, 6.0 }
 0x1fd   :  { %v1419_v27 = vmin.f32 %v1411_v18, 6.0  ;;  %v698_v62 = vadd.f32 %v682_v4, %v605_v46  ;;  %v1228_v30 = vsel %vm582_vm5, %v1214_v43, %v3535_v38  ;;  %v3660_v39 = vmul.f32 0.16666667, %v1425_v35 }
 0x1fe   :  { %v1244_v9 = vadd.f32 %v1228_v30, %v1111_v41  ;;  %v1424_v44 = vmul.f32 %v1416_v26, %v1392_v7  ;;  %v1227_v8 = vsel %vm582_vm5, %v3608_v0, %v1214_v43 }
 0x1ff   :  { %v878_v51 = vpop.permute.xlu1 %877  ;;  %v772_v59 = vadd.f32 %v3336_v1, %v698_v62  ;;  %v1427_v29 = vmul.f32 %v1419_v27, %v1395_v31  ;;  %v1243_v42 = vadd.f32 %v1227_v8, %v1110_v5 }
 0x200   :  { %v889_v32 = vsel %vm582_vm5, %v878_v51, %v880_v20  ;;  %v1220_v40 = vpop.permute.xlu0 %1219 }
 0x201   :  { %v1230_v6 = vsel %vm582_vm5, %v1220_v40, %v3547_v12  ;;  %v905_v45 = vadd.f32 %v889_v32, %v772_v59  ;;  %v3655_v3 = vmul.f32 0.16666667, %v1427_v29 }
 0x202   :  { %v1246_v37 = vadd.f32 %v1230_v6, %v1113_v54 }
 0x203   :  { %v1011_v17 = vpop.permute.xlu1 %1010  ;;  %v1447_v23 = vadd.f32 %v3655_v3, %v3660_v39 }
 0x204   :  { %v1022_v38 = vsel %vm675_vm6, %v1011_v17, %v1013_v50  ;;  %v1347_v47 = vpop.permute.xlu0 %1346 }
 0x205   :  { %v1038_v1 = vadd.f32 %v1022_v38, %v905_v45  ;;  %v1361_v20 = vsel %vm675_vm6, %v1347_v47, %v3554_v16  ;;  %v3671_v16 = vmul.f32 0.16666667, %v1424_v44  ;;  %v1448_v52 = vrot.slane %v1447_v23, 4 }
 0x206   :  { %v1377_v13 = vadd.f32 %v1361_v20, %v1244_v9 }
 0x207   :  { %v1218_v12 = vpop.permute.xlu1 %1217  ;;  %v1112_v34 = vadd.f32 %v3346_v53, %v1038_v1  ;;  %v1440_v53 = vadd.f32 %v3662_v33, %v3671_v16  ;;  %v1449_v4 = vadd.f32 %v1448_v52, %v1447_v23 }
 0x208   :  { %v1397_v7 = vadd.f32 %v3616_v49, %v1377_v13  ;;  %v1229_v25 = vsel %vm582_vm5, %v1218_v12, %v1220_v40  ;;  %v1353_v19 = vpop.permute.xlu0 %1352 }
 0x209   :  { %v1363_v31 = vsel %vm675_vm6, %v1353_v19, %v3556_v48  ;;  %v1245_v50 = vadd.f32 %v1229_v25, %v1112_v34  ;;  %v1441_v28 = vrot.slane %v1440_v53, 4  ;;  %v1450_v30 = vrot.slane %v1449_v4, 2 }
 0x20a   :  { %v1405_v36 = vadd.f32 3.0, %v1397_v7  ;;  %v1379_v61 = vadd.f32 %v1363_v31, %v1246_v37 }
 0x20b   :  { %v1351_v41 = vpop.permute.xlu1 %1350  ;;  %v1442_v58 = vadd.f32 %v1441_v28, %v1440_v53  ;;  %v1451_v35 = vadd.f32 %v1450_v30, %v1449_v4 }
 0x20c   :  { %v1413_v0 = vmax.f32 %v1405_v36, 0.0  ;;  %v1399_v2 = vadd.f32 %v3616_v49, %v1379_v61  ;;  %v1362_v57 = vsel %vm675_vm6, %v1351_v41, %v1353_v19  ;;  %v1345_v21 = vpop.permute.xlu0 %1344 }
 0x20d   :  { %v1378_v22 = vadd.f32 %v1362_v57, %v1245_v50  ;;  %v1360_v24 = vsel %vm675_vm6, %v1345_v21, %v1347_v47  ;;  %v1443_v26 = vrot.slane %v1442_v58, 2  ;;  %v1452_v44 = vrot.slane %v1451_v35, 1 }
 0x20e   :  { %v1421_v60 = vmin.f32 %v1413_v0, 6.0  ;;  %v1407_v48 = vadd.f32 3.0, %v1399_v2  ;;  %v1376_v18 = vadd.f32 %v1360_v24, %v1243_v42 }
 0x20f   :  { %v1398_v46 = vadd.f32 %v3619_v10, %v1378_v22  ;;  %v1444_v17 = vadd.f32 %v1443_v26, %v1442_v58  ;;  %v1453_v34 = vadd.f32 %v1452_v44, %v1451_v35  ;;  %v2374_v26 = vld [vmem:[%s3810_s11 + $0x40] sm:$0xff]  }
 0x210   :  { %v1415_v5 = vmax.f32 %v1407_v48, 0.0  ;;  %v1396_v43 = vadd.f32 %v3619_v10, %v1376_v18  ;;  %v1429_v56 = vmul.f32 %v1421_v60, %v1397_v7  ;;  %v2370_v48 = vld [vmem:[%s3805_s6] sm:$0xff]  }
 0x211   :  { %v1406_v54 = vadd.f32 3.0, %v1398_v46  ;;  %v1445_v13 = vrot.slane %v1444_v17, 1  ;;  %v1469_v36 = vpack.c.bf16 %v1453_v34, %v1453_v34  ;;  %v2376_v34 = vld [vmem:[%s3810_s11 + $0x48] sm:$0xff]  }
 0x212   :  { %v1423_v27 = vmin.f32 %v1415_v5, 6.0  ;;  %v1404_v49 = vadd.f32 3.0, %v1396_v43  ;;  %v3682_v59 = vmul.f32 0.16666667, %v1429_v56 }
 0x213   :  { %v1414_v62 = vmax.f32 %v1406_v54, 0.0  ;;  %v1446_v19 = vadd.f32 %v1445_v13, %v1444_v17  ;;  %v1509_v41 = vunpack.c.l.b16 %v1469_v36  ;;  %v2375_v13 = vld [vmem:[%s3810_s11] sm:$0xff]  }
 0x214   :  { %v1431_v63 = vmul.f32 %v1423_v27, %v1399_v2  ;;  %v1412_v9 = vmax.f32 %v1404_v49, 0.0  ;;  %v2169_v49 = vld [vmem:[%s3806_s7] ss:$0 sm:$0xff] }
 0x215   :  { %v1422_v51 = vmin.f32 %v1414_v62, 6.0  ;;  %v1468_v50 = vpack.c.bf16 %v1446_v19, %v1446_v19  ;;  %v2381_v19 = vld [vmem:[%s3810_s11 + $0x18] sm:$0xff]   ;;  %v2383_v36 = vld [vmem:[%s3810_s11 + $0x20] sm:$0xff]  }
 0x216   :  { %v3684_v29 = vmul.f32 0.16666667, %v1431_v63  ;;  %v1420_v32 = vmin.f32 %v1412_v9, 6.0 }
 0x217   :  { %v1430_v40 = vmul.f32 %v1422_v51, %v1398_v46  ;;  %v1508_v21 = vunpack.c.l.b16 %v1468_v50  ;;  %v2387_v50 = vld [vmem:[%s3810_s11 + $0x30] sm:$0xff]  }
 0x218   :  { %v1461_v10 = vadd.f32 %v3684_v29, %v3682_v59  ;;  %v1428_v6 = vmul.f32 %v1420_v32, %v1396_v43  ;;  %v1717_v43 = vld [vmem:[%s3807_s8] sm:$0x3] }
 0x219   :  { %v3688_v37 = vmul.f32 0.16666667, %v1430_v40  ;;  %v1731_v27 = vsel %vm1729_vm9, %v1717_v43, 0  ;;  %v2371_v40 = vld [vmem:[%s3809_s10] ss:$8 sps:$4 sm:$0xff]  }
 0x21a   :  { %v1462_v11 = vrot.slane %v1461_v10, 4  ;;  %v3690_v45 = vmul.f32 0.16666667, %v1428_v6 }
 0x21c   :  { %v1463_v38 = vadd.f32 %v1462_v11, %v1461_v10  ;;  %v1454_v47 = vadd.f32 %v3688_v37, %v3690_v45  ;;  %v2172_v10 = vld [vmem:[%s3808_s9] ss:$0 sm:$0xff] }
 0x21e   :  { %v1464_v1 = vrot.slane %v1463_v38, 2  ;;  %v1455_v20 = vrot.slane %v1454_v47, 4 }
 0x220   :  { %v1456_v12 = vadd.f32 %v1455_v20, %v1454_v47  ;;  %v1465_v23 = vadd.f32 %v1464_v1, %v1463_v38 }
 0x222   :  { %v1457_v8 = vrot.slane %v1456_v12, 2  ;;  %v1466_v7 = vrot.slane %v1465_v23, 1 }
 0x224   :  { %v1458_v25 = vadd.f32 %v1457_v8, %v1456_v12  ;;  %v1467_v31 = vadd.f32 %v1466_v7, %v1465_v23  ;;  %v2377_v23 = vld [vmem:[%s3810_s11 + $0x8] sm:$0xff]   ;;  %v2378_v8 = vld [vmem:[%s3810_s11 + $0x50] sm:$0xff]  }
 0x225   :  { %v2379_v7 = vld [vmem:[%s3810_s11 + $0x10] sm:$0xff]  }
 0x226   :  { %v1459_v61 = vrot.slane %v1458_v25, 1  ;;  %v1471_v53 = vpack.c.bf16 %v1467_v31, %v1467_v31  ;;  %v2382_v31 = vld [vmem:[%s3810_s11 + $0x60] sm:$0xff]  }
 0x228   :  { %v1460_v42 = vadd.f32 %v1459_v61, %v1458_v25  ;;  %v1511_v52 = vunpack.c.l.b16 %v1471_v53  ;;  %v2380_v25 = vld [vmem:[%s3810_s11 + $0x58] sm:$0xff]   ;;  %v2384_v61 = vld [vmem:[%s3810_s11 + $0x68] sm:$0xff]  }
 0x229   :  { %v2385_v53 = vld [vmem:[%s3810_s11 + $0x28] sm:$0xff]  }
 0x22a   :  { %v1470_v0 = vpack.c.bf16 %v1460_v42, %v1460_v42  ;;  %v1514_v2 = vsel %vm1512_vm7, %v1511_v52, %v1509_v41  ;;  %v2386_v42 = vld [vmem:[%s3810_s11 + $0x70] sm:$0xff]   ;;  %v2388_v41 = vld [vmem:[%s3810_s11 + $0x78] sm:$0xff]  }
 0x22b   :  { %v1516_v57 = vpack.c.b16 %v1514_v2, %v1514_v2  ;;  %v2389_v52 = vld [vmem:[%s3810_s11 + $0x38] sm:$0xff]  }
 0x22c   :  { %v1510_v22 = vunpack.c.l.b16 %v1470_v0  ;;  %v2425_v0 = vmov 1966171168  }
 0x22d   :  { %1647 = vmatprep.mubr.bf16.mxu0 %v1516_v57  ;;  %v1838_v2 = vunpack.c.l.s4 %v2425_v0 }
 0x22e   :  { %v1513_v24 = vsel %vm1512_vm7, %v1510_v22, %v1508_v21  ;;  %v3889_v22 = vld [vmem:[#allocation5_spill] sm:$0xff] }
 0x22f   :  { %v1515_v60 = vpack.c.b16 %v1513_v24, %v1513_v24  ;;  %v1839_v57 = vunpack.c.0.s8 %v1838_v2 }
 0x231   :  { %1648 = vmatmul.mubr.bf16.vlgmr.msra.gmra.mrb[8].mxu0 %v1515_v60  ;;  %v1842_v24 = vsub.s32 %v1839_v57, %v3889_v22 }
 0x232   :  { %2298 = vmatpush3.bf16.msra.mxu0 %v2370_v48  ;;  %2299 = vmatprep.mubr.msk.bf16.mxu0 %vm2424_vm8, %v2423_v55 }
 0x233   :  { %2303 = vmatprep.subr.bf16.mxu0 %v2423_v55 }
 0x304   :  { %v2239_v18 = vpop.f32.mrb[8].mxu0 }
 0x305   :  { %v2240_v46 = vpop.f32.mrb[9].mxu0 }
 0x306   :  { %v2241_v28 = vadd.f32 %v2240_v46, %v2239_v18  ;;  %v2242_v4 = vpop.f32.mrb[10].mxu0 }
 0x307   :  { %v2243_v5 = vpop.f32.mrb[11].mxu0 }
 0x308   :  { %v1655_v54 = vmul.f32 0.00390625, %v2241_v28 }
 0x30a   :  { %v1656_v56 = vpack.c.bf16 %v1655_v54, %v1655_v54 }
 0x30c   :  { %2300 = vmatmul.mubr.msk.bf16.vlgmr.msra.gmra.mrb[12].mxu0 %vm529_vm0, %v1656_v56 }
 0x30d   :  { %2304 = vmatpush3.bf16.msra.mxu0 %v1731_v27  ;;  %2305 = vmatprep.mubr.msk.bf16.mxu0 %vm2424_vm8, %v2423_v55  ;;  %v2373_v55 = vld [vmem:[%s3809_s10 + $0x4] ss:$8 sps:$4 sm:$0xff]  }
 0x30e   :  { %1793 = vmatprep.subr.bf16.mxu1 %v2373_v55 }
 0x30f   :  { %1794 = vmatpush1.bf16.msra.mxu1 %v2371_v40 }
 0x310   :  { %2249 = vmatprep.subr.bf16.mxu1 %v2374_v26 }
 0x3df   :  { %v1709_v62 = vpop.f32.mrb[12].mxu0 }
 0x3e0   :  { %v1710_v58 = vadd.f32 %v2169_v49, %v1709_v62  ;;  %v2301_v30 = vpop.f32.mrb[13].mxu0 }
 0x3e1   :  { %v1712_v63 = vpop.f32.mrb[14].mxu0 }
 0x3e2   :  { %v1715_v9 = vmax.f32 %v1710_v58, 0.0  ;;  %v2302_v51 = vpop.f32.mrb[15].mxu0 }
 0x3e4   :  { %v1716_v32 = vpack.c.bf16 %v1715_v9, %v1715_v9 }
 0x3e6   :  { %2306 = vmatmul.mubr.msk.bf16.vlgmr.msra.gmra.mrb[16].mxu0 %vm1725_vm10, %v1716_v32 }
 0x4b9   :  { %v1767_v6 = vpop.f32.mrb[16].mxu0 }
 0x4ba   :  { %v1768_v35 = vadd.f32 %v2172_v10, %v1767_v6  ;;  %v2307_v11 = vpop.f32.mrb[17].mxu0 }
 0x4bb   :  { %v1770_v17 = vpop.f32.mrb[18].mxu0 }
 0x4bc   :  { %v1773_v38 = vadd.f32 3.0, %v1768_v35  ;;  %v2308_v47 = vpop.f32.mrb[19].mxu0 }
 0x4be   :  { %v1774_v44 = vmax.f32 %v1773_v38, 0.0 }
 0x4c0   :  { %v1775_v1 = vmin.f32 %v1774_v44, 6.0 }
 0x4c2   :  { %v1776_v20 = vmul.f32 0.16666667, %v1775_v1  ;;  %v2393_v1 = vld [vmem:[%s3799_s0 + $0x8] sm:$0xff]  }
 0x4c4   :  { %v1777_v12 = vpack.c.bf16 %v1776_v20, %v1776_v20  ;;  %v2077_v20 = vunpack.c.l.bf16 %v2393_v1 }
 0x4c6   :  { %2176 = vmatmul.mubr.msk.bf16.vlgmr.msra.gmra.mrb[4].mxu1 %vm529_vm0, %v1777_v12 }
 0x4c7   :  { %2250 = vmatpush3.bf16.msra.mxu1 %v2375_v13 }
 0x4c8   :  { %2251 = vmatprep.subr.bf16.mxu1 %v2376_v34 }
 0x4cb   :  { %2252 = vmatpush3.bf16.msra.mxu1 %v2377_v23 }
 0x4cc   :  { %2253 = vmatprep.subr.bf16.mxu1 %v2378_v8  ;;  %v2078_v8 = vunpack.c.h.bf16 %v2393_v1 }
 0x4cf   :  { %2254 = vmatpush3.bf16.msra.mxu1 %v2379_v7 }
 0x4d0   :  { %2255 = vmatprep.subr.bf16.mxu1 %v2380_v25 }
 0x4d3   :  { %2256 = vmatpush3.bf16.msra.mxu1 %v2381_v19 }
 0x4d4   :  { %2257 = vmatprep.subr.bf16.mxu1 %v2382_v31 }
 0x4d7   :  { %2258 = vmatpush3.bf16.msra.mxu1 %v2383_v36 }
 0x4d8   :  { %2259 = vmatprep.subr.bf16.mxu1 %v2384_v61 }
 0x4db   :  { %2260 = vmatpush3.bf16.msra.mxu1 %v2385_v53 }
 0x4dc   :  { %2261 = vmatprep.subr.bf16.mxu1 %v2386_v42 }
 0x4df   :  { %2262 = vmatpush3.bf16.msra.mxu1 %v2387_v50 }
 0x4e0   :  { %2263 = vmatprep.subr.bf16.mxu1 %v2388_v41 }
 0x4e3   :  { %2264 = vmatpush3.bf16.msra.mxu1 %v2389_v52 }
 0x599   :  { %v1827_v21 = vpop.f32.mrb[4].mxu1 }
 0x59a   :  { %v1829_v60 = vpop.f32.mrb[5].mxu1 }
 0x59b   :  { %v1836_v48 = vcombine.low %v1827_v21, %v1829_v60  ;;  %v1831_v18 = vpop.f32.mrb[6].mxu1 }
 0x59c   :  { %v1832_v46 = vpop.f32.mrb[7].mxu1 }
 0x59d   :  { %v1843_v28 = vrot.slane %v1836_v48, %v1842_v24 }
 0x59f   :  { %v1844_v4 = vcombine.high %v1843_v28, %v1843_v28  ;;  %v1851_v5 = vrot.slane %v1843_v28, %v1842_v24 }
 0x5a1   :  { %v1858_v43 = vrot.slane %v1844_v4, %v1842_v24  ;;  %v1862_v54 = vrot.slane %v1851_v5, %v3882_v15  ;;  %v1866_v56 = vrot.slane %v1851_v5, %v3870_v14 }
 0x5a3   :  { %v1879_v27 = vmul.f32 %v1862_v54, %v3671_v16  ;;  %v1881_v49 = vmul.f32 %v1862_v54, %v3662_v33  ;;  %v1880_v62 = vmul.f32 %v1866_v56, %v3660_v39  ;;  %v1882_v58 = vmul.f32 %v1866_v56, %v3655_v3 }
 0x5a4   :  { %v1874_v30 = vrot.slane %v1858_v43, %v3870_v14  ;;  %v1870_v40 = vrot.slane %v1858_v43, %v3882_v15  ;;  %v2177_v14 = vld [vmem:[%s3811_s12] ss:$0 sm:$0xff]  ;;  %s2426_s12 = smov [#allocation2]  }
 0x5a5   :  { %v1888_v63 = vpack.c.bf16 %v1882_v58, %v1880_v62  ;;  %v1887_v9 = vpack.c.bf16 %v1881_v49, %v1879_v27  ;;  %v2392_v15 = vld [vmem:[%s3799_s0] sm:$0xff]   ;;  %s2108_s21 = sshll.u32 %s2426_s12, 4  ;;  %s2109_s21 = int_to_ptr.vmem [resolvable:$true] %s2108_s21 }
 0x5a6   :  { %v1884_v51 = vmul.f32 %v1874_v30, %v3682_v59  ;;  %v1886_v32 = vmul.f32 %v1874_v30, %v3684_v29  ;;  %v1883_v33 = vmul.f32 %v1870_v40, %v3690_v45  ;;  %v1885_v39 = vmul.f32 %v1870_v40, %v3688_v37  ;;  %s2394_s23 = scalar_lea.vmem %s2109_s21, 256  ;;  %p2399_p1 = scmp.lt.s32.totalorder %s2109_s21, %s2109_s21 }
 0x5a7   :  { %2058 = vmatprep.mubr.bf16.mxu1 %v1888_v63  ;;  %v2075_v29 = vunpack.c.l.bf16 %v2392_v15  ;;  %v2076_v35 = vunpack.c.h.bf16 %v2392_v15  ;;  %p2395_p0 = scmp.ne.s32.totalorder %s2109_s21, %s2394_s23  ;;  %p2400_p2 = scmp.lt.s32.totalorder %s2394_s23, %s2394_s23 }
 0x5a8   :  { %2059 = vmatmul.mubr.bf16.vlgmr.msra.gmra.mrb[8].mxu1 %v1887_v9  ;;  %v1890_v55 = vpack.c.bf16 %v1886_v32, %v1884_v51  ;;  %v1889_v16 = vpack.c.bf16 %v1885_v39, %v1883_v33 }
 0x5a9   :  { %p2401_p3 = por %p2400_p2, %p2399_p1 }
 0x5aa   :  { %2066 = vmatprep.mubr.bf16.mxu1 %v1890_v55 }
 0x5ab   :  { %p2402_p4 = pnand %p2401_p3, %p2395_p0 }
 0x5b0   :  { %2067 = vmatmul.mubr.bf16.gmra.mrb[12].mxu1 %v1889_v16 }
 0x67b   :  { %v2265_v3 = vpop.f32.mrb[8].mxu1 }
 0x67c   :  { %v2266_v59 = vpop.f32.mrb[9].mxu1 }
 0x67d   :  { %v2267_v26 = vadd.f32 %v2266_v59, %v2265_v3  ;;  %v2268_v10 = vpop.f32.mrb[10].mxu1 }
 0x67e   :  { %v2269_v6 = vpop.f32.mrb[11].mxu1 }
 0x67f   :  { %v2061_v45 = vadd.f32 %v2267_v26, %v2177_v14  ;;  %v2270_v11 = vadd.f32 %v2269_v6, %v2268_v10 }
 0x681   :  { %v2079_v37 = vadd.f32 %v2075_v29, %v2061_v45  ;;  %v2064_v17 = vadd.f32 %v2270_v11, %v2177_v14 }
 0x683   :  { %v2080_v38 = vadd.f32 %v2076_v35, %v2064_v17  ;;  %v2271_v47 = vpop.f32.mrb[12].mxu1 }
 0x684   :  { %v2272_v44 = vpop.f32.mrb[13].mxu1 }
 0x685   :  { %v2205_v13 = vpack.c.bf16 %v2080_v38, %v2079_v37  ;;  %v2273_v12 = vadd.f32 %v2272_v44, %v2271_v47  ;;  %v2274_v34 = vpop.f32.mrb[14].mxu1 }
 0x686   :  { %v2275_v23 = vpop.f32.mrb[15].mxu1 }
 0x687   :  { %2206 = vst [vmem:[#allocation2] sm:$0xff] %v2205_v13   ;;  %v2069_v7 = vadd.f32 %v2273_v12, %v2177_v14  ;;  %v2276_v25 = vadd.f32 %v2275_v23, %v2274_v34 }
 0x689   :  { %v2081_v19 = vadd.f32 %v2077_v20, %v2069_v7  ;;  %v2072_v31 = vadd.f32 %v2276_v25, %v2177_v14 }
 0x68b   :  { %v2082_v36 = vadd.f32 %v2078_v8, %v2072_v31 }
 0x68d   :  { %v2210_v61 = vpack.c.bf16 %v2082_v36, %v2081_v19 }
 0x68f   :  { %2212 = vst [vmem:[#allocation2 + $0x8] sm:$0xff] %v2210_v61  }
 0x690   :  { %2405 = shalt.err (!%p2402_p4)
}
 0x691   :  { %s2406_s5 = scalar_lea.hbm %s3812_s13, 256 }
 0x692   :  { %p2407_p5 = scmp.ne.s32.totalorder %s3812_s13, %s2406_s5  ;;  %p2410_p6 = scmp.lt.u32.totalorder %s2406_s5, %s3812_s13 }
 0x694   :  { %p2412_p7 = pnand %p2410_p6, %p2407_p5 }
 0x696   :  { %2415 = shalt.err (!%p2412_p7)
}
 0x697   :  { %s2427_s26 = smov 64   ;;  %s2428_s6 = smov 4  }
 0x698   :  { %2114 = dma.vmem_to_hbm [thread:$0]  %s2109_s21, 256, %s3812_s13, [#allocation3], %s2427_s26, %s2427_s26, %s2428_s6  }
 0x699   :  { %2416 = dma.done.wait [#allocation3], 256  }
 0x69a   :  { %2417 = vsyncadd [#allocation3], 4294967040 }
 0x69b   :  { %2118 = vsyncpa [#allocation3], 1 }

</bundles_post_ra>
